<compile_context>
chip_gen: v6e
topology: v6e:2x2x1
jax: 0.10.0
libtpu: 0.0.40
codegen_flags: <defaults>
</compile_context>

<pallas_src>
import functools

import numpy as np
import jax
import jax.numpy as jnp
from jax import lax
from jax.experimental import pallas as pl
from jax.experimental.pallas import tpu as pltpu


# ----------------------------------------------------------------------------
# Host-side (one-time) builders for the structured matrices.  These run once at
# parameter-construction time; the kernel itself only does matmuls + add + relu.
# ----------------------------------------------------------------------------
def _interp_matrix_np(n_in, n_out):
    """Row-stochastic (n_out, n_in) bilinear matrix, align_corners=True."""
    A = np.zeros((n_out, n_in), np.float32)
    if n_in == 1:
        A[:, 0] = 1.0
        return A
    src = np.arange(n_out, dtype=np.float64) * (n_in - 1) / (n_out - 1)
    i0 = np.clip(np.floor(src).astype(np.int64), 0, n_in - 1)
    i1 = np.clip(i0 + 1, 0, n_in - 1)
    frac = (src - i0).astype(np.float32)
    A[np.arange(n_out), i0] += 1.0 - frac
    A[np.arange(n_out), i1] += frac
    return A


def _shift_mats_np(H):
    """S[dh] (H,H): (S[dh] @ x)[h] = x[h + dh - 1] (zero outside), dh in 0..2."""
    S = np.zeros((3, H, H), np.float32)
    for dh in range(3):
        for h in range(H):
            hi = h + dh - 1
            if 0 <= hi < H:
                S[dh, h, hi] = 1.0
    return S


def _conv3_tap_mats_np(eff_w, W):
    """Right tap matrices for a 3x3/pad=1 conv in (H, W*C) layout.

    M[dh, (w+dw-1)*Cin + ci, w*Cout + co] = eff_w[co, ci, dh, dw]
    (W zero-padding folded in)."""
    Cout, Cin = eff_w.shape[:2]
    M = np.zeros((3, W * Cin, W * Cout), np.float32)
    for dh in range(3):
        for dw in range(3):
            blk = eff_w[:, :, dh, dw].T                       # (Cin, Cout)
            for w in range(W):
                wi = w + dw - 1
                if 0 <= wi < W:
                    M[dh, wi * Cin:(wi + 1) * Cin, w * Cout:(w + 1) * Cout] = blk
    return M


def _conv2s2_mats_np(eff_w, H, W):
    """Even/odd row selectors + tap matrices for a 2x2 stride-2 conv."""
    Cout, Cin = eff_w.shape[:2]
    Ho, Wo = H // 2, W // 2
    E = np.zeros((2, Ho, H), np.float32)
    for dh in range(2):
        E[dh, np.arange(Ho), 2 * np.arange(Ho) + dh] = 1.0
    M = np.zeros((2, W * Cin, Wo * Cout), np.float32)
    for dh in range(2):
        for dw in range(2):
            blk = eff_w[:, :, dh, dw].T                       # (Cin, Cout)
            for wo in range(Wo):
                wi = 2 * wo + dw
                M[dh, wi * Cin:(wi + 1) * Cin, wo * Cout:(wo + 1) * Cout] = blk
    return E, M


def _width_interp_mat_np(w, C):
    """(w*C, 2w*C): bilinear x2 along W, identity over channels."""
    Aw = _interp_matrix_np(w, 2 * w)
    MW = np.zeros((w * C, 2 * w * C), np.float32)
    for wo in range(2 * w):
        for wi in range(w):
            a = Aw[wo, wi]
            if a != 0.0:
                for c in range(C):
                    MW[wi * C + c, wo * C + c] = a
    return MW


def _fused_up_conv_mats_np(eff_w, eff_b, h, w, Cin):
    """Bilinear x2 upsample (align_corners=True) composed with the following
    3x3 conv:  out = sum_dh L[dh] @ x @ R[dh] + bias_row  (exact, both linear)."""
    Ah = _interp_matrix_np(h, 2 * h)                          # (2h, h)
    L = np.einsum('dij,jk->dik', _shift_mats_np(2 * h), Ah)   # (3, 2h, h)
    MW = _width_interp_mat_np(w, Cin)                         # (w*Cin, 2w*Cin)
    Mc = _conv3_tap_mats_np(eff_w, 2 * w)                     # (3, 2w*Cin, 2w*Cout)
    R = np.einsum('ij,djk->dik', MW, Mc)                      # (3, w*Cin, 2w*Cout)
    brow = np.tile(eff_b, 2 * w)[None, :]
    return L.astype(np.float32), R.astype(np.float32), brow.astype(np.float32)


# ----------------------------------------------------------------------------
# Synthetic (deterministic) parameters with eval-mode BN folded into the conv.
# ----------------------------------------------------------------------------
def _make_effective_conv(key, cin, cout, ksize, with_bn=True):
    k1, k2, k3, k4, k5, k6 = jax.random.split(key, 6)
    w = jax.random.normal(k1, (cout, cin, ksize, ksize), jnp.float32) * 0.2  # OIHW
    b = jax.random.normal(k2, (cout,), jnp.float32) * 0.1
    if with_bn:
        gamma = 1.0 + 0.1 * jax.random.normal(k3, (cout,), jnp.float32)
        beta = 0.1 * jax.random.normal(k4, (cout,), jnp.float32)
        rmean = 0.1 * jax.random.normal(k5, (cout,), jnp.float32)
        rvar = 1.0 + 0.1 * jnp.abs(jax.random.normal(k6, (cout,), jnp.float32))
        scale = gamma / jnp.sqrt(rvar + 1e-5)
        eff_w = w * scale[:, None, None, None]     # fold BN scale into weights
        eff_b = beta + scale * (b - rmean)
    else:
        eff_w, eff_b = w, b
    return np.asarray(eff_w), np.asarray(eff_b)


def build_params(key, in_dim, hidden_dim1, hidden_dim2, class_dim, H, W):
    keys = jax.random.split(key, 8)
    eff = {
        'd1':  _make_effective_conv(keys[0], in_dim, hidden_dim1, 2),
        'd2':  _make_effective_conv(keys[1], hidden_dim1, hidden_dim2, 2),
        'u1a': _make_effective_conv(keys[2], hidden_dim2, hidden_dim2 // 2, 3),
        'u1b': _make_effective_conv(keys[3], hidden_dim2 // 2, hidden_dim2, 3),
        'u2a': _make_effective_conv(keys[4], hidden_dim2, hidden_dim2 // 2, 3),
        'u2b': _make_effective_conv(keys[5], hidden_dim2 // 2, hidden_dim2, 3),
        's1':  _make_effective_conv(keys[6], hidden_dim2, class_dim, 3),
        's2':  _make_effective_conv(keys[7], class_dim, class_dim, 3, with_bn=False),
    }

    H2, W2 = H // 2, W // 2          # after downsampler conv 1
    H4, W4 = H // 4, W // 4          # after downsampler conv 2

    d1_E, d1_M = _conv2s2_mats_np(eff['d1'][0], H, W)
    d1_b = np.tile(eff['d1'][1], W2)[None, :]
    d2_E, d2_M = _conv2s2_mats_np(eff['d2'][0], H2, W2)
    d2_b = np.tile(eff['d2'][1], W4)[None, :]

    u1a_L, u1a_R, u1a_b = _fused_up_conv_mats_np(*eff['u1a'], H4, W4, hidden_dim2)
    S_h2 = _shift_mats_np(H2)
    u1b_M = _conv3_tap_mats_np(eff['u1b'][0], W2)
    u1b_b = np.tile(eff['u1b'][1], W2)[None, :]

    u2a_L, u2a_R, u2a_b = _fused_up_conv_mats_np(*eff['u2a'], H2, W2, hidden_dim2)
    S_h = _shift_mats_np(H)
    u2b_M = _conv3_tap_mats_np(eff['u2b'][0], W)
    u2b_b = np.tile(eff['u2b'][1], W)[None, :]

    s1_M = _conv3_tap_mats_np(eff['s1'][0], W)
    s1_b = np.tile(eff['s1'][1], W)[None, :]
    s2_M = _conv3_tap_mats_np(eff['s2'][0], W)
    s2_b = np.tile(eff['s2'][1], W)[None, :]

    mats = [d1_E, d1_M, d1_b, d2_E, d2_M, d2_b,
            u1a_L, u1a_R, u1a_b, S_h2, u1b_M, u1b_b,
            u2a_L, u2a_R, u2a_b, S_h, u2b_M, u2b_b,
            s1_M, s1_b, s2_M, s2_b]
    return [jnp.asarray(m, jnp.float32) for m in mats], eff


# ----------------------------------------------------------------------------
# The single fused kernel.
# ----------------------------------------------------------------------------
def _mm(a, b):
    return jnp.dot(a, b, preferred_element_type=jnp.float32)


def _sum_lxr(x, l_ref, r_ref, b_ref, n_taps, relu):
    """out = act( sum_t L[t] @ x @ R[t] + bias_row ) — the one layer primitive."""
    acc = _mm(_mm(l_ref[0], x), r_ref[0])
    for t in range(1, n_taps):
        acc = acc + _mm(_mm(l_ref[t], x), r_ref[t])
    acc = acc + b_ref[...]
    if relu:
        acc = jnp.maximum(acc, 0.0)
    return acc


def _segm_head_kernel(x_ref,
                      d1_E, d1_M, d1_b, d2_E, d2_M, d2_b,
                      u1a_L, u1a_R, u1a_b, S_h2, u1b_M, u1b_b,
                      u2a_L, u2a_R, u2a_b, S_h, u2b_M, u2b_b,
                      s1_M, s1_b, s2_M, s2_b,
                      o_ref):
    x = x_ref[0]                                       # (H, W*Cin) lane-dense
    # downsampler: (Conv2x2/s2 + BN + ReLU) x 2
    h = _sum_lxr(x, d1_E, d1_M, d1_b, 2, True)         # (H/2, W/2 * hd1)
    h = _sum_lxr(h, d2_E, d2_M, d2_b, 2, True)         # (H/4, W/4 * hd2)
    # upsampler1: bilinear x2 folded into first conv of its DoubleConv
    h = _sum_lxr(h, u1a_L, u1a_R, u1a_b, 3, True)      # (H/2, W/2 * hd2/2)
    h = _sum_lxr(h, S_h2, u1b_M, u1b_b, 3, True)       # (H/2, W/2 * hd2)
    # upsampler2
    h = _sum_lxr(h, u2a_L, u2a_R, u2a_b, 3, True)      # (H,   W * hd2/2)
    h = _sum_lxr(h, S_h, u2b_M, u2b_b, 3, True)        # (H,   W * hd2)
    # segm head: Conv3x3+BN+ReLU, Conv3x3 (no BN/ReLU on the last conv)
    h = _sum_lxr(h, S_h, s1_M, s1_b, 3, True)          # (H, W * class_dim)
    h = _sum_lxr(h, S_h, s2_M, s2_b, 3, False)         # (H, W * class_dim)
    o_ref[0] = h.astype(o_ref.dtype)


def _const_spec(arr):
    nd = arr.ndim
    return pl.BlockSpec(arr.shape, lambda n, _nd=nd: (0,) * _nd)


@functools.partial(jax.jit, static_argnums=(2,))
def segm_head_forward(img_feat_nchw, mats, class_dim):
    """img_feat_nchw: (N, Cin, H, W) -> {'segm_logits': (N, class_dim, H, W)}."""
    N, Cin, H, W = img_feat_nchw.shape
    # NCHW -> lane-dense (N, H, W*Cin); the only XLA glue left in the forward.
    x = jnp.transpose(img_feat_nchw, (0, 2, 3, 1)).reshape(N, H, W * Cin)

    out = pl.pallas_call(
        _segm_head_kernel,
        grid=(N,),
        out_shape=jax.ShapeDtypeStruct((N, H, W * class_dim), jnp.float32),
        in_specs=[pl.BlockSpec((1, H, W * Cin), lambda n: (n, 0, 0))]
                 + [_const_spec(m) for m in mats],
        out_specs=pl.BlockSpec((1, H, W * class_dim), lambda n: (n, 0, 0)),
        compiler_params=pltpu.CompilerParams(
            dimension_semantics=("parallel",)),   # batch=2 -> the 2 TCs on v7x
    )(x, *mats)

    logits = out.reshape(N, H, W, class_dim).transpose(0, 3, 1, 2)
    return {'segm_logits': logits}


# ----------------------------------------------------------------------------
# Pure-JAX reference (same folded parameters, HIGHEST precision) for correctness.
# ----------------------------------------------------------------------------
@jax.jit
def _reference_forward(img_feat_nchw, eff):
    x = jnp.transpose(img_feat_nchw, (0, 2, 3, 1)).astype(jnp.float32)

    def conv(h, wb, stride, padding):
        w, b = wb
        y = lax.conv_general_dilated(
            h, jnp.transpose(w, (2, 3, 1, 0)),
            window_strides=(stride, stride), padding=padding,
            dimension_numbers=('NHWC', 'HWIO', 'NHWC'),
            precision=lax.Precision.HIGHEST)
        return y + b

    def up2(h):
        _, hh, ww, _ = h.shape
        Ah = jnp.asarray(_interp_matrix_np(hh, 2 * hh))
        Aw = jnp.asarray(_interp_matrix_np(ww, 2 * ww))
        return jnp.einsum('Hh,Ww,nhwc->nHWc', Ah, Aw, h,
                          precision=lax.Precision.HIGHEST)

    p3 = [(1, 1), (1, 1)]
    h = jax.nn.relu(conv(x, eff['d1'], 2, 'VALID'))
    h = jax.nn.relu(conv(h, eff['d2'], 2, 'VALID'))
    h = up2(h)
    h = jax.nn.relu(conv(h, eff['u1a'], 1, p3))
    h = jax.nn.relu(conv(h, eff['u1b'], 1, p3))
    h = up2(h)
    h = jax.nn.relu(conv(h, eff['u2a'], 1, p3))
    h = jax.nn.relu(conv(h, eff['u2b'], 1, p3))
    h = jax.nn.relu(conv(h, eff['s1'], 1, p3))
    h = conv(h, eff['s2'], 1, p3)
    return jnp.transpose(h, (0, 3, 1, 2))


if __name__ == "__main__":
    in_dim, hidden_dim1, hidden_dim2, class_dim = 4, 8, 8, 4
    N, H, W = 2, 16, 16

    key = jax.random.PRNGKey(0)
    pkey, xkey = jax.random.split(key)
    mats, eff = build_params(pkey, in_dim, hidden_dim1, hidden_dim2, class_dim, H, W)
    img_feat = jax.random.normal(xkey, (N, in_dim, H, W), jnp.float32)

    out = segm_head_forward(img_feat, mats, class_dim)
    logits = jax.block_until_ready(out['segm_logits'])
    assert logits.shape == (N, class_dim, H, W)
    assert logits.dtype == jnp.float32

    ref = jax.block_until_ready(_reference_forward(img_feat, eff))
    np.testing.assert_allclose(np.asarray(logits), np.asarray(ref),
                               rtol=2e-2, atol=2e-2)
    print("KERNEL_OK")
</pallas_src>

<mosaic_0001>
module attributes {stable_mosaic.version = 11 : i64} {
  func.func @_segm_head_kernel(%arg0: i32, %arg1: memref<1x16x64xf32, #tpu.memory_space<vmem>>, %arg2: memref<2x8x16xf32, #tpu.memory_space<vmem>>, %arg3: memref<2x64x64xf32, #tpu.memory_space<vmem>>, %arg4: memref<1x64xf32, #tpu.memory_space<vmem>>, %arg5: memref<2x4x8xf32, #tpu.memory_space<vmem>>, %arg6: memref<2x64x32xf32, #tpu.memory_space<vmem>>, %arg7: memref<1x32xf32, #tpu.memory_space<vmem>>, %arg8: memref<3x8x4xf32, #tpu.memory_space<vmem>>, %arg9: memref<3x32x32xf32, #tpu.memory_space<vmem>>, %arg10: memref<1x32xf32, #tpu.memory_space<vmem>>, %arg11: memref<3x8x8xf32, #tpu.memory_space<vmem>>, %arg12: memref<3x32x64xf32, #tpu.memory_space<vmem>>, %arg13: memref<1x64xf32, #tpu.memory_space<vmem>>, %arg14: memref<3x16x8xf32, #tpu.memory_space<vmem>>, %arg15: memref<3x64x64xf32, #tpu.memory_space<vmem>>, %arg16: memref<1x64xf32, #tpu.memory_space<vmem>>, %arg17: memref<3x16x16xf32, #tpu.memory_space<vmem>>, %arg18: memref<3x64x128xf32, #tpu.memory_space<vmem>>, %arg19: memref<1x128xf32, #tpu.memory_space<vmem>>, %arg20: memref<3x128x64xf32, #tpu.memory_space<vmem>>, %arg21: memref<1x64xf32, #tpu.memory_space<vmem>>, %arg22: memref<3x64x64xf32, #tpu.memory_space<vmem>>, %arg23: memref<1x64xf32, #tpu.memory_space<vmem>>, %arg24: memref<1x16x64xf32, #tpu.memory_space<vmem>>) attributes {dimension_semantics = [#tpu.dimension_semantics<parallel>], iteration_bounds = array<i64: 2>, scalar_prefetch = 0 : i64, scratch_operands = 0 : i64, tpu.core_type = #tpu.core_type<tc>, window_params = [{transform_indices = @transform_0, window_bounds = array<i64: 1, 16, 64>}, {pipeline_mode = #tpu.pipeline_mode<synchronous>, transform_indices = @transform_1, window_bounds = array<i64: 2, 8, 16>}, {pipeline_mode = #tpu.pipeline_mode<synchronous>, transform_indices = @transform_2, window_bounds = array<i64: 2, 64, 64>}, {pipeline_mode = #tpu.pipeline_mode<synchronous>, transform_indices = @transform_3, window_bounds = array<i64: 1, 64>}, {pipeline_mode = #tpu.pipeline_mode<synchronous>, transform_indices = @transform_4, window_bounds = array<i64: 2, 4, 8>}, {pipeline_mode = #tpu.pipeline_mode<synchronous>, transform_indices = @transform_5, window_bounds = array<i64: 2, 64, 32>}, {pipeline_mode = #tpu.pipeline_mode<synchronous>, transform_indices = @transform_6, window_bounds = array<i64: 1, 32>}, {pipeline_mode = #tpu.pipeline_mode<synchronous>, transform_indices = @transform_7, window_bounds = array<i64: 3, 8, 4>}, {pipeline_mode = #tpu.pipeline_mode<synchronous>, transform_indices = @transform_8, window_bounds = array<i64: 3, 32, 32>}, {pipeline_mode = #tpu.pipeline_mode<synchronous>, transform_indices = @transform_9, window_bounds = array<i64: 1, 32>}, {pipeline_mode = #tpu.pipeline_mode<synchronous>, transform_indices = @transform_10, window_bounds = array<i64: 3, 8, 8>}, {pipeline_mode = #tpu.pipeline_mode<synchronous>, transform_indices = @transform_11, window_bounds = array<i64: 3, 32, 64>}, {pipeline_mode = #tpu.pipeline_mode<synchronous>, transform_indices = @transform_12, window_bounds = array<i64: 1, 64>}, {pipeline_mode = #tpu.pipeline_mode<synchronous>, transform_indices = @transform_13, window_bounds = array<i64: 3, 16, 8>}, {pipeline_mode = #tpu.pipeline_mode<synchronous>, transform_indices = @transform_14, window_bounds = array<i64: 3, 64, 64>}, {pipeline_mode = #tpu.pipeline_mode<synchronous>, transform_indices = @transform_15, window_bounds = array<i64: 1, 64>}, {pipeline_mode = #tpu.pipeline_mode<synchronous>, transform_indices = @transform_16, window_bounds = array<i64: 3, 16, 16>}, {pipeline_mode = #tpu.pipeline_mode<synchronous>, transform_indices = @transform_17, window_bounds = array<i64: 3, 64, 128>}, {pipeline_mode = #tpu.pipeline_mode<synchronous>, transform_indices = @transform_18, window_bounds = array<i64: 1, 128>}, {pipeline_mode = #tpu.pipeline_mode<synchronous>, transform_indices = @transform_19, window_bounds = array<i64: 3, 128, 64>}, {pipeline_mode = #tpu.pipeline_mode<synchronous>, transform_indices = @transform_20, window_bounds = array<i64: 1, 64>}, {pipeline_mode = #tpu.pipeline_mode<synchronous>, transform_indices = @transform_21, window_bounds = array<i64: 3, 64, 64>}, {pipeline_mode = #tpu.pipeline_mode<synchronous>, transform_indices = @transform_22, window_bounds = array<i64: 1, 64>}, {transform_indices = @transform_23, window_bounds = array<i64: 1, 16, 64>}]} {
    %c0 = arith.constant 0 : index
    %c0_0 = arith.constant 0 : index
    %c0_1 = arith.constant 0 : index
    %0 = vector.load %arg1[%c0, %c0_0, %c0_1] : memref<1x16x64xf32, #tpu.memory_space<vmem>>, vector<1x16x64xf32>
    %1 = vector.shape_cast %0 : vector<1x16x64xf32> to vector<16x64xf32>
    %c0_2 = arith.constant 0 : index
    %c0_3 = arith.constant 0 : index
    %c0_4 = arith.constant 0 : index
    %2 = vector.load %arg2[%c0_2, %c0_3, %c0_4] : memref<2x8x16xf32, #tpu.memory_space<vmem>>, vector<1x8x16xf32>
    %3 = vector.shape_cast %2 : vector<1x8x16xf32> to vector<8x16xf32>
    %cst = arith.constant dense<0.000000e+00> : vector<8x64xf32>
    %4 = tpu.matmul %3, %1, %cst {dimension_numbers = #tpu.dot_dimension_numbers<[1], [0], [0], [1], [0, 0, 1, 1], [], []>} : vector<8x16xf32>, vector<16x64xf32>, vector<8x64xf32> -> vector<8x64xf32>
    %c0_5 = arith.constant 0 : index
    %c0_6 = arith.constant 0 : index
    %c0_7 = arith.constant 0 : index
    %5 = vector.load %arg3[%c0_5, %c0_6, %c0_7] : memref<2x64x64xf32, #tpu.memory_space<vmem>>, vector<1x64x64xf32>
    %6 = vector.shape_cast %5 : vector<1x64x64xf32> to vector<64x64xf32>
    %cst_8 = arith.constant dense<0.000000e+00> : vector<8x64xf32>
    %7 = tpu.matmul %4, %6, %cst_8 {dimension_numbers = #tpu.dot_dimension_numbers<[1], [0], [0], [1], [0, 0, 1, 1], [], []>} : vector<8x64xf32>, vector<64x64xf32>, vector<8x64xf32> -> vector<8x64xf32>
    %c1 = arith.constant 1 : index
    %c0_9 = arith.constant 0 : index
    %c0_10 = arith.constant 0 : index
    %8 = vector.load %arg2[%c1, %c0_9, %c0_10] : memref<2x8x16xf32, #tpu.memory_space<vmem>>, vector<1x8x16xf32>
    %9 = vector.shape_cast %8 : vector<1x8x16xf32> to vector<8x16xf32>
    %cst_11 = arith.constant dense<0.000000e+00> : vector<8x64xf32>
    %10 = tpu.matmul %9, %1, %cst_11 {dimension_numbers = #tpu.dot_dimension_numbers<[1], [0], [0], [1], [0, 0, 1, 1], [], []>} : vector<8x16xf32>, vector<16x64xf32>, vector<8x64xf32> -> vector<8x64xf32>
    %c1_12 = arith.constant 1 : index
    %c0_13 = arith.constant 0 : index
    %c0_14 = arith.constant 0 : index
    %11 = vector.load %arg3[%c1_12, %c0_13, %c0_14] : memref<2x64x64xf32, #tpu.memory_space<vmem>>, vector<1x64x64xf32>
    %12 = vector.shape_cast %11 : vector<1x64x64xf32> to vector<64x64xf32>
    %cst_15 = arith.constant dense<0.000000e+00> : vector<8x64xf32>
    %13 = tpu.matmul %10, %12, %cst_15 {dimension_numbers = #tpu.dot_dimension_numbers<[1], [0], [0], [1], [0, 0, 1, 1], [], []>} : vector<8x64xf32>, vector<64x64xf32>, vector<8x64xf32> -> vector<8x64xf32>
    %14 = arith.addf %7, %13 : vector<8x64xf32>
    %c0_16 = arith.constant 0 : index
    %c0_17 = arith.constant 0 : index
    %15 = vector.load %arg4[%c0_16, %c0_17] : memref<1x64xf32, #tpu.memory_space<vmem>>, vector<1x64xf32>
    %16 = vector.broadcast %15 : vector<1x64xf32> to vector<8x64xf32>
    %17 = arith.addf %14, %16 : vector<8x64xf32>
    %cst_18 = arith.constant 0.000000e+00 : f32
    %18 = vector.broadcast %cst_18 : f32 to vector<8x64xf32>
    %19 = arith.maximumf %17, %18 : vector<8x64xf32>
    %c0_19 = arith.constant 0 : index
    %c0_20 = arith.constant 0 : index
    %c0_21 = arith.constant 0 : index
    %20 = vector.load %arg5[%c0_19, %c0_20, %c0_21] : memref<2x4x8xf32, #tpu.memory_space<vmem>>, vector<1x4x8xf32>
    %21 = vector.shape_cast %20 : vector<1x4x8xf32> to vector<4x8xf32>
    %cst_22 = arith.constant dense<0.000000e+00> : vector<4x64xf32>
    %22 = tpu.matmul %21, %19, %cst_22 {dimension_numbers = #tpu.dot_dimension_numbers<[1], [0], [0], [1], [0, 0, 1, 1], [], []>} : vector<4x8xf32>, vector<8x64xf32>, vector<4x64xf32> -> vector<4x64xf32>
    %c0_23 = arith.constant 0 : index
    %c0_24 = arith.constant 0 : index
    %c0_25 = arith.constant 0 : index
    %23 = vector.load %arg6[%c0_23, %c0_24, %c0_25] : memref<2x64x32xf32, #tpu.memory_space<vmem>>, vector<1x64x32xf32>
    %24 = vector.shape_cast %23 : vector<1x64x32xf32> to vector<64x32xf32>
    %cst_26 = arith.constant dense<0.000000e+00> : vector<4x32xf32>
    %25 = tpu.matmul %22, %24, %cst_26 {dimension_numbers = #tpu.dot_dimension_numbers<[1], [0], [0], [1], [0, 0, 1, 1], [], []>} : vector<4x64xf32>, vector<64x32xf32>, vector<4x32xf32> -> vector<4x32xf32>
    %c1_27 = arith.constant 1 : index
    %c0_28 = arith.constant 0 : index
    %c0_29 = arith.constant 0 : index
    %26 = vector.load %arg5[%c1_27, %c0_28, %c0_29] : memref<2x4x8xf32, #tpu.memory_space<vmem>>, vector<1x4x8xf32>
    %27 = vector.shape_cast %26 : vector<1x4x8xf32> to vector<4x8xf32>
    %cst_30 = arith.constant dense<0.000000e+00> : vector<4x64xf32>
    %28 = tpu.matmul %27, %19, %cst_30 {dimension_numbers = #tpu.dot_dimension_numbers<[1], [0], [0], [1], [0, 0, 1, 1], [], []>} : vector<4x8xf32>, vector<8x64xf32>, vector<4x64xf32> -> vector<4x64xf32>
    %c1_31 = arith.constant 1 : index
    %c0_32 = arith.constant 0 : index
    %c0_33 = arith.constant 0 : index
    %29 = vector.load %arg6[%c1_31, %c0_32, %c0_33] : memref<2x64x32xf32, #tpu.memory_space<vmem>>, vector<1x64x32xf32>
    %30 = vector.shape_cast %29 : vector<1x64x32xf32> to vector<64x32xf32>
    %cst_34 = arith.constant dense<0.000000e+00> : vector<4x32xf32>
    %31 = tpu.matmul %28, %30, %cst_34 {dimension_numbers = #tpu.dot_dimension_numbers<[1], [0], [0], [1], [0, 0, 1, 1], [], []>} : vector<4x64xf32>, vector<64x32xf32>, vector<4x32xf32> -> vector<4x32xf32>
    %32 = arith.addf %25, %31 : vector<4x32xf32>
    %c0_35 = arith.constant 0 : index
    %c0_36 = arith.constant 0 : index
    %33 = vector.load %arg7[%c0_35, %c0_36] : memref<1x32xf32, #tpu.memory_space<vmem>>, vector<1x32xf32>
    %34 = vector.broadcast %33 : vector<1x32xf32> to vector<4x32xf32>
    %35 = arith.addf %32, %34 : vector<4x32xf32>
    %cst_37 = arith.constant 0.000000e+00 : f32
    %36 = vector.broadcast %cst_37 : f32 to vector<4x32xf32>
    %37 = arith.maximumf %35, %36 : vector<4x32xf32>
    %c0_38 = arith.constant 0 : index
    %c0_39 = arith.constant 0 : index
    %c0_40 = arith.constant 0 : index
    %38 = vector.load %arg8[%c0_38, %c0_39, %c0_40] : memref<3x8x4xf32, #tpu.memory_space<vmem>>, vector<1x8x4xf32>
    %39 = vector.shape_cast %38 : vector<1x8x4xf32> to vector<8x4xf32>
    %cst_41 = arith.constant dense<0.000000e+00> : vector<8x32xf32>
    %40 = tpu.matmul %39, %37, %cst_41 {dimension_numbers = #tpu.dot_dimension_numbers<[1], [0], [0], [1], [0, 0, 1, 1], [], []>} : vector<8x4xf32>, vector<4x32xf32>, vector<8x32xf32> -> vector<8x32xf32>
    %c0_42 = arith.constant 0 : index
    %c0_43 = arith.constant 0 : index
    %c0_44 = arith.constant 0 : index
    %41 = vector.load %arg9[%c0_42, %c0_43, %c0_44] : memref<3x32x32xf32, #tpu.memory_space<vmem>>, vector<1x32x32xf32>
    %42 = vector.shape_cast %41 : vector<1x32x32xf32> to vector<32x32xf32>
    %cst_45 = arith.constant dense<0.000000e+00> : vector<8x32xf32>
    %43 = tpu.matmul %40, %42, %cst_45 {dimension_numbers = #tpu.dot_dimension_numbers<[1], [0], [0], [1], [0, 0, 1, 1], [], []>} : vector<8x32xf32>, vector<32x32xf32>, vector<8x32xf32> -> vector<8x32xf32>
    %c1_46 = arith.constant 1 : index
    %c0_47 = arith.constant 0 : index
    %c0_48 = arith.constant 0 : index
    %44 = vector.load %arg8[%c1_46, %c0_47, %c0_48] : memref<3x8x4xf32, #tpu.memory_space<vmem>>, vector<1x8x4xf32>
    %45 = vector.shape_cast %44 : vector<1x8x4xf32> to vector<8x4xf32>
    %cst_49 = arith.constant dense<0.000000e+00> : vector<8x32xf32>
    %46 = tpu.matmul %45, %37, %cst_49 {dimension_numbers = #tpu.dot_dimension_numbers<[1], [0], [0], [1], [0, 0, 1, 1], [], []>} : vector<8x4xf32>, vector<4x32xf32>, vector<8x32xf32> -> vector<8x32xf32>
    %c1_50 = arith.constant 1 : index
    %c0_51 = arith.constant 0 : index
    %c0_52 = arith.constant 0 : index
    %47 = vector.load %arg9[%c1_50, %c0_51, %c0_52] : memref<3x32x32xf32, #tpu.memory_space<vmem>>, vector<1x32x32xf32>
    %48 = vector.shape_cast %47 : vector<1x32x32xf32> to vector<32x32xf32>
    %cst_53 = arith.constant dense<0.000000e+00> : vector<8x32xf32>
    %49 = tpu.matmul %46, %48, %cst_53 {dimension_numbers = #tpu.dot_dimension_numbers<[1], [0], [0], [1], [0, 0, 1, 1], [], []>} : vector<8x32xf32>, vector<32x32xf32>, vector<8x32xf32> -> vector<8x32xf32>
    %50 = arith.addf %43, %49 : vector<8x32xf32>
    %c2 = arith.constant 2 : index
    %c0_54 = arith.constant 0 : index
    %c0_55 = arith.constant 0 : index
    %51 = vector.load %arg8[%c2, %c0_54, %c0_55] : memref<3x8x4xf32, #tpu.memory_space<vmem>>, vector<1x8x4xf32>
    %52 = vector.shape_cast %51 : vector<1x8x4xf32> to vector<8x4xf32>
    %cst_56 = arith.constant dense<0.000000e+00> : vector<8x32xf32>
    %53 = tpu.matmul %52, %37, %cst_56 {dimension_numbers = #tpu.dot_dimension_numbers<[1], [0], [0], [1], [0, 0, 1, 1], [], []>} : vector<8x4xf32>, vector<4x32xf32>, vector<8x32xf32> -> vector<8x32xf32>
    %c2_57 = arith.constant 2 : index
    %c0_58 = arith.constant 0 : index
    %c0_59 = arith.constant 0 : index
    %54 = vector.load %arg9[%c2_57, %c0_58, %c0_59] : memref<3x32x32xf32, #tpu.memory_space<vmem>>, vector<1x32x32xf32>
    %55 = vector.shape_cast %54 : vector<1x32x32xf32> to vector<32x32xf32>
    %cst_60 = arith.constant dense<0.000000e+00> : vector<8x32xf32>
    %56 = tpu.matmul %53, %55, %cst_60 {dimension_numbers = #tpu.dot_dimension_numbers<[1], [0], [0], [1], [0, 0, 1, 1], [], []>} : vector<8x32xf32>, vector<32x32xf32>, vector<8x32xf32> -> vector<8x32xf32>
    %57 = arith.addf %50, %56 : vector<8x32xf32>
    %c0_61 = arith.constant 0 : index
    %c0_62 = arith.constant 0 : index
    %58 = vector.load %arg10[%c0_61, %c0_62] : memref<1x32xf32, #tpu.memory_space<vmem>>, vector<1x32xf32>
    %59 = vector.broadcast %58 : vector<1x32xf32> to vector<8x32xf32>
    %60 = arith.addf %57, %59 : vector<8x32xf32>
    %cst_63 = arith.constant 0.000000e+00 : f32
    %61 = vector.broadcast %cst_63 : f32 to vector<8x32xf32>
    %62 = arith.maximumf %60, %61 : vector<8x32xf32>
    %c0_64 = arith.constant 0 : index
    %c0_65 = arith.constant 0 : index
    %c0_66 = arith.constant 0 : index
    %63 = vector.load %arg11[%c0_64, %c0_65, %c0_66] : memref<3x8x8xf32, #tpu.memory_space<vmem>>, vector<1x8x8xf32>
    %64 = vector.shape_cast %63 : vector<1x8x8xf32> to vector<8x8xf32>
    %cst_67 = arith.constant dense<0.000000e+00> : vector<8x32xf32>
    %65 = tpu.matmul %64, %62, %cst_67 {dimension_numbers = #tpu.dot_dimension_numbers<[1], [0], [0], [1], [0, 0, 1, 1], [], []>} : vector<8x8xf32>, vector<8x32xf32>, vector<8x32xf32> -> vector<8x32xf32>
    %c0_68 = arith.constant 0 : index
    %c0_69 = arith.constant 0 : index
    %c0_70 = arith.constant 0 : index
    %66 = vector.load %arg12[%c0_68, %c0_69, %c0_70] : memref<3x32x64xf32, #tpu.memory_space<vmem>>, vector<1x32x64xf32>
    %67 = vector.shape_cast %66 : vector<1x32x64xf32> to vector<32x64xf32>
    %cst_71 = arith.constant dense<0.000000e+00> : vector<8x64xf32>
    %68 = tpu.matmul %65, %67, %cst_71 {dimension_numbers = #tpu.dot_dimension_numbers<[1], [0], [0], [1], [0, 0, 1, 1], [], []>} : vector<8x32xf32>, vector<32x64xf32>, vector<8x64xf32> -> vector<8x64xf32>
    %c1_72 = arith.constant 1 : index
    %c0_73 = arith.constant 0 : index
    %c0_74 = arith.constant 0 : index
    %69 = vector.load %arg11[%c1_72, %c0_73, %c0_74] : memref<3x8x8xf32, #tpu.memory_space<vmem>>, vector<1x8x8xf32>
    %70 = vector.shape_cast %69 : vector<1x8x8xf32> to vector<8x8xf32>
    %cst_75 = arith.constant dense<0.000000e+00> : vector<8x32xf32>
    %71 = tpu.matmul %70, %62, %cst_75 {dimension_numbers = #tpu.dot_dimension_numbers<[1], [0], [0], [1], [0, 0, 1, 1], [], []>} : vector<8x8xf32>, vector<8x32xf32>, vector<8x32xf32> -> vector<8x32xf32>
    %c1_76 = arith.constant 1 : index
    %c0_77 = arith.constant 0 : index
    %c0_78 = arith.constant 0 : index
    %72 = vector.load %arg12[%c1_76, %c0_77, %c0_78] : memref<3x32x64xf32, #tpu.memory_space<vmem>>, vector<1x32x64xf32>
    %73 = vector.shape_cast %72 : vector<1x32x64xf32> to vector<32x64xf32>
    %cst_79 = arith.constant dense<0.000000e+00> : vector<8x64xf32>
    %74 = tpu.matmul %71, %73, %cst_79 {dimension_numbers = #tpu.dot_dimension_numbers<[1], [0], [0], [1], [0, 0, 1, 1], [], []>} : vector<8x32xf32>, vector<32x64xf32>, vector<8x64xf32> -> vector<8x64xf32>
    %75 = arith.addf %68, %74 : vector<8x64xf32>
    %c2_80 = arith.constant 2 : index
    %c0_81 = arith.constant 0 : index
    %c0_82 = arith.constant 0 : index
    %76 = vector.load %arg11[%c2_80, %c0_81, %c0_82] : memref<3x8x8xf32, #tpu.memory_space<vmem>>, vector<1x8x8xf32>
    %77 = vector.shape_cast %76 : vector<1x8x8xf32> to vector<8x8xf32>
    %cst_83 = arith.constant dense<0.000000e+00> : vector<8x32xf32>
    %78 = tpu.matmul %77, %62, %cst_83 {dimension_numbers = #tpu.dot_dimension_numbers<[1], [0], [0], [1], [0, 0, 1, 1], [], []>} : vector<8x8xf32>, vector<8x32xf32>, vector<8x32xf32> -> vector<8x32xf32>
    %c2_84 = arith.constant 2 : index
    %c0_85 = arith.constant 0 : index
    %c0_86 = arith.constant 0 : index
    %79 = vector.load %arg12[%c2_84, %c0_85, %c0_86] : memref<3x32x64xf32, #tpu.memory_space<vmem>>, vector<1x32x64xf32>
    %80 = vector.shape_cast %79 : vector<1x32x64xf32> to vector<32x64xf32>
    %cst_87 = arith.constant dense<0.000000e+00> : vector<8x64xf32>
    %81 = tpu.matmul %78, %80, %cst_87 {dimension_numbers = #tpu.dot_dimension_numbers<[1], [0], [0], [1], [0, 0, 1, 1], [], []>} : vector<8x32xf32>, vector<32x64xf32>, vector<8x64xf32> -> vector<8x64xf32>
    %82 = arith.addf %75, %81 : vector<8x64xf32>
    %c0_88 = arith.constant 0 : index
    %c0_89 = arith.constant 0 : index
    %83 = vector.load %arg13[%c0_88, %c0_89] : memref<1x64xf32, #tpu.memory_space<vmem>>, vector<1x64xf32>
    %84 = vector.broadcast %83 : vector<1x64xf32> to vector<8x64xf32>
    %85 = arith.addf %82, %84 : vector<8x64xf32>
    %cst_90 = arith.constant 0.000000e+00 : f32
    %86 = vector.broadcast %cst_90 : f32 to vector<8x64xf32>
    %87 = arith.maximumf %85, %86 : vector<8x64xf32>
    %c0_91 = arith.constant 0 : index
    %c0_92 = arith.constant 0 : index
    %c0_93 = arith.constant 0 : index
    %88 = vector.load %arg14[%c0_91, %c0_92, %c0_93] : memref<3x16x8xf32, #tpu.memory_space<vmem>>, vector<1x16x8xf32>
    %89 = vector.shape_cast %88 : vector<1x16x8xf32> to vector<16x8xf32>
    %cst_94 = arith.constant dense<0.000000e+00> : vector<16x64xf32>
    %90 = tpu.matmul %89, %87, %cst_94 {dimension_numbers = #tpu.dot_dimension_numbers<[1], [0], [0], [1], [0, 0, 1, 1], [], []>} : vector<16x8xf32>, vector<8x64xf32>, vector<16x64xf32> -> vector<16x64xf32>
    %c0_95 = arith.constant 0 : index
    %c0_96 = arith.constant 0 : index
    %c0_97 = arith.constant 0 : index
    %91 = vector.load %arg15[%c0_95, %c0_96, %c0_97] : memref<3x64x64xf32, #tpu.memory_space<vmem>>, vector<1x64x64xf32>
    %92 = vector.shape_cast %91 : vector<1x64x64xf32> to vector<64x64xf32>
    %cst_98 = arith.constant dense<0.000000e+00> : vector<16x64xf32>
    %93 = tpu.matmul %90, %92, %cst_98 {dimension_numbers = #tpu.dot_dimension_numbers<[1], [0], [0], [1], [0, 0, 1, 1], [], []>} : vector<16x64xf32>, vector<64x64xf32>, vector<16x64xf32> -> vector<16x64xf32>
    %c1_99 = arith.constant 1 : index
    %c0_100 = arith.constant 0 : index
    %c0_101 = arith.constant 0 : index
    %94 = vector.load %arg14[%c1_99, %c0_100, %c0_101] : memref<3x16x8xf32, #tpu.memory_space<vmem>>, vector<1x16x8xf32>
    %95 = vector.shape_cast %94 : vector<1x16x8xf32> to vector<16x8xf32>
    %cst_102 = arith.constant dense<0.000000e+00> : vector<16x64xf32>
    %96 = tpu.matmul %95, %87, %cst_102 {dimension_numbers = #tpu.dot_dimension_numbers<[1], [0], [0], [1], [0, 0, 1, 1], [], []>} : vector<16x8xf32>, vector<8x64xf32>, vector<16x64xf32> -> vector<16x64xf32>
    %c1_103 = arith.constant 1 : index
    %c0_104 = arith.constant 0 : index
    %c0_105 = arith.constant 0 : index
    %97 = vector.load %arg15[%c1_103, %c0_104, %c0_105] : memref<3x64x64xf32, #tpu.memory_space<vmem>>, vector<1x64x64xf32>
    %98 = vector.shape_cast %97 : vector<1x64x64xf32> to vector<64x64xf32>
    %cst_106 = arith.constant dense<0.000000e+00> : vector<16x64xf32>
    %99 = tpu.matmul %96, %98, %cst_106 {dimension_numbers = #tpu.dot_dimension_numbers<[1], [0], [0], [1], [0, 0, 1, 1], [], []>} : vector<16x64xf32>, vector<64x64xf32>, vector<16x64xf32> -> vector<16x64xf32>
    %100 = arith.addf %93, %99 : vector<16x64xf32>
    %c2_107 = arith.constant 2 : index
    %c0_108 = arith.constant 0 : index
    %c0_109 = arith.constant 0 : index
    %101 = vector.load %arg14[%c2_107, %c0_108, %c0_109] : memref<3x16x8xf32, #tpu.memory_space<vmem>>, vector<1x16x8xf32>
    %102 = vector.shape_cast %101 : vector<1x16x8xf32> to vector<16x8xf32>
    %cst_110 = arith.constant dense<0.000000e+00> : vector<16x64xf32>
    %103 = tpu.matmul %102, %87, %cst_110 {dimension_numbers = #tpu.dot_dimension_numbers<[1], [0], [0], [1], [0, 0, 1, 1], [], []>} : vector<16x8xf32>, vector<8x64xf32>, vector<16x64xf32> -> vector<16x64xf32>
    %c2_111 = arith.constant 2 : index
    %c0_112 = arith.constant 0 : index
    %c0_113 = arith.constant 0 : index
    %104 = vector.load %arg15[%c2_111, %c0_112, %c0_113] : memref<3x64x64xf32, #tpu.memory_space<vmem>>, vector<1x64x64xf32>
    %105 = vector.shape_cast %104 : vector<1x64x64xf32> to vector<64x64xf32>
    %cst_114 = arith.constant dense<0.000000e+00> : vector<16x64xf32>
    %106 = tpu.matmul %103, %105, %cst_114 {dimension_numbers = #tpu.dot_dimension_numbers<[1], [0], [0], [1], [0, 0, 1, 1], [], []>} : vector<16x64xf32>, vector<64x64xf32>, vector<16x64xf32> -> vector<16x64xf32>
    %107 = arith.addf %100, %106 : vector<16x64xf32>
    %c0_115 = arith.constant 0 : index
    %c0_116 = arith.constant 0 : index
    %108 = vector.load %arg16[%c0_115, %c0_116] : memref<1x64xf32, #tpu.memory_space<vmem>>, vector<1x64xf32>
    %109 = vector.broadcast %108 : vector<1x64xf32> to vector<16x64xf32>
    %110 = arith.addf %107, %109 : vector<16x64xf32>
    %cst_117 = arith.constant 0.000000e+00 : f32
    %111 = vector.broadcast %cst_117 : f32 to vector<16x64xf32>
    %112 = arith.maximumf %110, %111 : vector<16x64xf32>
    %c0_118 = arith.constant 0 : index
    %c0_119 = arith.constant 0 : index
    %c0_120 = arith.constant 0 : index
    %113 = vector.load %arg17[%c0_118, %c0_119, %c0_120] : memref<3x16x16xf32, #tpu.memory_space<vmem>>, vector<1x16x16xf32>
    %114 = vector.shape_cast %113 : vector<1x16x16xf32> to vector<16x16xf32>
    %cst_121 = arith.constant dense<0.000000e+00> : vector<16x64xf32>
    %115 = tpu.matmul %114, %112, %cst_121 {dimension_numbers = #tpu.dot_dimension_numbers<[1], [0], [0], [1], [0, 0, 1, 1], [], []>} : vector<16x16xf32>, vector<16x64xf32>, vector<16x64xf32> -> vector<16x64xf32>
    %c0_122 = arith.constant 0 : index
    %c0_123 = arith.constant 0 : index
    %c0_124 = arith.constant 0 : index
    %116 = vector.load %arg18[%c0_122, %c0_123, %c0_124] : memref<3x64x128xf32, #tpu.memory_space<vmem>>, vector<1x64x128xf32>
    %117 = vector.shape_cast %116 : vector<1x64x128xf32> to vector<64x128xf32>
    %cst_125 = arith.constant dense<0.000000e+00> : vector<16x128xf32>
    %118 = tpu.matmul %115, %117, %cst_125 {dimension_numbers = #tpu.dot_dimension_numbers<[1], [0], [0], [1], [0, 0, 1, 1], [], []>} : vector<16x64xf32>, vector<64x128xf32>, vector<16x128xf32> -> vector<16x128xf32>
    %c1_126 = arith.constant 1 : index
    %c0_127 = arith.constant 0 : index
    %c0_128 = arith.constant 0 : index
    %119 = vector.load %arg17[%c1_126, %c0_127, %c0_128] : memref<3x16x16xf32, #tpu.memory_space<vmem>>, vector<1x16x16xf32>
    %120 = vector.shape_cast %119 : vector<1x16x16xf32> to vector<16x16xf32>
    %cst_129 = arith.constant dense<0.000000e+00> : vector<16x64xf32>
    %121 = tpu.matmul %120, %112, %cst_129 {dimension_numbers = #tpu.dot_dimension_numbers<[1], [0], [0], [1], [0, 0, 1, 1], [], []>} : vector<16x16xf32>, vector<16x64xf32>, vector<16x64xf32> -> vector<16x64xf32>
    %c1_130 = arith.constant 1 : index
    %c0_131 = arith.constant 0 : index
    %c0_132 = arith.constant 0 : index
    %122 = vector.load %arg18[%c1_130, %c0_131, %c0_132] : memref<3x64x128xf32, #tpu.memory_space<vmem>>, vector<1x64x128xf32>
    %123 = vector.shape_cast %122 : vector<1x64x128xf32> to vector<64x128xf32>
    %cst_133 = arith.constant dense<0.000000e+00> : vector<16x128xf32>
    %124 = tpu.matmul %121, %123, %cst_133 {dimension_numbers = #tpu.dot_dimension_numbers<[1], [0], [0], [1], [0, 0, 1, 1], [], []>} : vector<16x64xf32>, vector<64x128xf32>, vector<16x128xf32> -> vector<16x128xf32>
    %125 = arith.addf %118, %124 : vector<16x128xf32>
    %c2_134 = arith.constant 2 : index
    %c0_135 = arith.constant 0 : index
    %c0_136 = arith.constant 0 : index
    %126 = vector.load %arg17[%c2_134, %c0_135, %c0_136] : memref<3x16x16xf32, #tpu.memory_space<vmem>>, vector<1x16x16xf32>
    %127 = vector.shape_cast %126 : vector<1x16x16xf32> to vector<16x16xf32>
    %cst_137 = arith.constant dense<0.000000e+00> : vector<16x64xf32>
    %128 = tpu.matmul %127, %112, %cst_137 {dimension_numbers = #tpu.dot_dimension_numbers<[1], [0], [0], [1], [0, 0, 1, 1], [], []>} : vector<16x16xf32>, vector<16x64xf32>, vector<16x64xf32> -> vector<16x64xf32>
    %c2_138 = arith.constant 2 : index
    %c0_139 = arith.constant 0 : index
    %c0_140 = arith.constant 0 : index
    %129 = vector.load %arg18[%c2_138, %c0_139, %c0_140] : memref<3x64x128xf32, #tpu.memory_space<vmem>>, vector<1x64x128xf32>
    %130 = vector.shape_cast %129 : vector<1x64x128xf32> to vector<64x128xf32>
    %cst_141 = arith.constant dense<0.000000e+00> : vector<16x128xf32>
    %131 = tpu.matmul %128, %130, %cst_141 {dimension_numbers = #tpu.dot_dimension_numbers<[1], [0], [0], [1], [0, 0, 1, 1], [], []>} : vector<16x64xf32>, vector<64x128xf32>, vector<16x128xf32> -> vector<16x128xf32>
    %132 = arith.addf %125, %131 : vector<16x128xf32>
    %c0_142 = arith.constant 0 : index
    %c0_143 = arith.constant 0 : index
    %133 = vector.load %arg19[%c0_142, %c0_143] : memref<1x128xf32, #tpu.memory_space<vmem>>, vector<1x128xf32>
    %134 = vector.broadcast %133 : vector<1x128xf32> to vector<16x128xf32>
    %135 = arith.addf %132, %134 : vector<16x128xf32>
    %cst_144 = arith.constant 0.000000e+00 : f32
    %136 = vector.broadcast %cst_144 : f32 to vector<16x128xf32>
    %137 = arith.maximumf %135, %136 : vector<16x128xf32>
    %c0_145 = arith.constant 0 : index
    %c0_146 = arith.constant 0 : index
    %c0_147 = arith.constant 0 : index
    %138 = vector.load %arg17[%c0_145, %c0_146, %c0_147] : memref<3x16x16xf32, #tpu.memory_space<vmem>>, vector<1x16x16xf32>
    %139 = vector.shape_cast %138 : vector<1x16x16xf32> to vector<16x16xf32>
    %cst_148 = arith.constant dense<0.000000e+00> : vector<16x128xf32>
    %140 = tpu.matmul %139, %137, %cst_148 {dimension_numbers = #tpu.dot_dimension_numbers<[1], [0], [0], [1], [0, 0, 1, 1], [], []>} : vector<16x16xf32>, vector<16x128xf32>, vector<16x128xf32> -> vector<16x128xf32>
    %c0_149 = arith.constant 0 : index
    %c0_150 = arith.constant 0 : index
    %c0_151 = arith.constant 0 : index
    %141 = vector.load %arg20[%c0_149, %c0_150, %c0_151] : memref<3x128x64xf32, #tpu.memory_space<vmem>>, vector<1x128x64xf32>
    %142 = vector.shape_cast %141 : vector<1x128x64xf32> to vector<128x64xf32>
    %cst_152 = arith.constant dense<0.000000e+00> : vector<16x64xf32>
    %143 = tpu.matmul %140, %142, %cst_152 {dimension_numbers = #tpu.dot_dimension_numbers<[1], [0], [0], [1], [0, 0, 1, 1], [], []>} : vector<16x128xf32>, vector<128x64xf32>, vector<16x64xf32> -> vector<16x64xf32>
    %c1_153 = arith.constant 1 : index
    %c0_154 = arith.constant 0 : index
    %c0_155 = arith.constant 0 : index
    %144 = vector.load %arg17[%c1_153, %c0_154, %c0_155] : memref<3x16x16xf32, #tpu.memory_space<vmem>>, vector<1x16x16xf32>
    %145 = vector.shape_cast %144 : vector<1x16x16xf32> to vector<16x16xf32>
    %cst_156 = arith.constant dense<0.000000e+00> : vector<16x128xf32>
    %146 = tpu.matmul %145, %137, %cst_156 {dimension_numbers = #tpu.dot_dimension_numbers<[1], [0], [0], [1], [0, 0, 1, 1], [], []>} : vector<16x16xf32>, vector<16x128xf32>, vector<16x128xf32> -> vector<16x128xf32>
    %c1_157 = arith.constant 1 : index
    %c0_158 = arith.constant 0 : index
    %c0_159 = arith.constant 0 : index
    %147 = vector.load %arg20[%c1_157, %c0_158, %c0_159] : memref<3x128x64xf32, #tpu.memory_space<vmem>>, vector<1x128x64xf32>
    %148 = vector.shape_cast %147 : vector<1x128x64xf32> to vector<128x64xf32>
    %cst_160 = arith.constant dense<0.000000e+00> : vector<16x64xf32>
    %149 = tpu.matmul %146, %148, %cst_160 {dimension_numbers = #tpu.dot_dimension_numbers<[1], [0], [0], [1], [0, 0, 1, 1], [], []>} : vector<16x128xf32>, vector<128x64xf32>, vector<16x64xf32> -> vector<16x64xf32>
    %150 = arith.addf %143, %149 : vector<16x64xf32>
    %c2_161 = arith.constant 2 : index
    %c0_162 = arith.constant 0 : index
    %c0_163 = arith.constant 0 : index
    %151 = vector.load %arg17[%c2_161, %c0_162, %c0_163] : memref<3x16x16xf32, #tpu.memory_space<vmem>>, vector<1x16x16xf32>
    %152 = vector.shape_cast %151 : vector<1x16x16xf32> to vector<16x16xf32>
    %cst_164 = arith.constant dense<0.000000e+00> : vector<16x128xf32>
    %153 = tpu.matmul %152, %137, %cst_164 {dimension_numbers = #tpu.dot_dimension_numbers<[1], [0], [0], [1], [0, 0, 1, 1], [], []>} : vector<16x16xf32>, vector<16x128xf32>, vector<16x128xf32> -> vector<16x128xf32>
    %c2_165 = arith.constant 2 : index
    %c0_166 = arith.constant 0 : index
    %c0_167 = arith.constant 0 : index
    %154 = vector.load %arg20[%c2_165, %c0_166, %c0_167] : memref<3x128x64xf32, #tpu.memory_space<vmem>>, vector<1x128x64xf32>
    %155 = vector.shape_cast %154 : vector<1x128x64xf32> to vector<128x64xf32>
    %cst_168 = arith.constant dense<0.000000e+00> : vector<16x64xf32>
    %156 = tpu.matmul %153, %155, %cst_168 {dimension_numbers = #tpu.dot_dimension_numbers<[1], [0], [0], [1], [0, 0, 1, 1], [], []>} : vector<16x128xf32>, vector<128x64xf32>, vector<16x64xf32> -> vector<16x64xf32>
    %157 = arith.addf %150, %156 : vector<16x64xf32>
    %c0_169 = arith.constant 0 : index
    %c0_170 = arith.constant 0 : index
    %158 = vector.load %arg21[%c0_169, %c0_170] : memref<1x64xf32, #tpu.memory_space<vmem>>, vector<1x64xf32>
    %159 = vector.broadcast %158 : vector<1x64xf32> to vector<16x64xf32>
    %160 = arith.addf %157, %159 : vector<16x64xf32>
    %cst_171 = arith.constant 0.000000e+00 : f32
    %161 = vector.broadcast %cst_171 : f32 to vector<16x64xf32>
    %162 = arith.maximumf %160, %161 : vector<16x64xf32>
    %c0_172 = arith.constant 0 : index
    %c0_173 = arith.constant 0 : index
    %c0_174 = arith.constant 0 : index
    %163 = vector.load %arg17[%c0_172, %c0_173, %c0_174] : memref<3x16x16xf32, #tpu.memory_space<vmem>>, vector<1x16x16xf32>
    %164 = vector.shape_cast %163 : vector<1x16x16xf32> to vector<16x16xf32>
    %cst_175 = arith.constant dense<0.000000e+00> : vector<16x64xf32>
    %165 = tpu.matmul %164, %162, %cst_175 {dimension_numbers = #tpu.dot_dimension_numbers<[1], [0], [0], [1], [0, 0, 1, 1], [], []>} : vector<16x16xf32>, vector<16x64xf32>, vector<16x64xf32> -> vector<16x64xf32>
    %c0_176 = arith.constant 0 : index
    %c0_177 = arith.constant 0 : index
    %c0_178 = arith.constant 0 : index
    %166 = vector.load %arg22[%c0_176, %c0_177, %c0_178] : memref<3x64x64xf32, #tpu.memory_space<vmem>>, vector<1x64x64xf32>
    %167 = vector.shape_cast %166 : vector<1x64x64xf32> to vector<64x64xf32>
    %cst_179 = arith.constant dense<0.000000e+00> : vector<16x64xf32>
    %168 = tpu.matmul %165, %167, %cst_179 {dimension_numbers = #tpu.dot_dimension_numbers<[1], [0], [0], [1], [0, 0, 1, 1], [], []>} : vector<16x64xf32>, vector<64x64xf32>, vector<16x64xf32> -> vector<16x64xf32>
    %c1_180 = arith.constant 1 : index
    %c0_181 = arith.constant 0 : index
    %c0_182 = arith.constant 0 : index
    %169 = vector.load %arg17[%c1_180, %c0_181, %c0_182] : memref<3x16x16xf32, #tpu.memory_space<vmem>>, vector<1x16x16xf32>
    %170 = vector.shape_cast %169 : vector<1x16x16xf32> to vector<16x16xf32>
    %cst_183 = arith.constant dense<0.000000e+00> : vector<16x64xf32>
    %171 = tpu.matmul %170, %162, %cst_183 {dimension_numbers = #tpu.dot_dimension_numbers<[1], [0], [0], [1], [0, 0, 1, 1], [], []>} : vector<16x16xf32>, vector<16x64xf32>, vector<16x64xf32> -> vector<16x64xf32>
    %c1_184 = arith.constant 1 : index
    %c0_185 = arith.constant 0 : index
    %c0_186 = arith.constant 0 : index
    %172 = vector.load %arg22[%c1_184, %c0_185, %c0_186] : memref<3x64x64xf32, #tpu.memory_space<vmem>>, vector<1x64x64xf32>
    %173 = vector.shape_cast %172 : vector<1x64x64xf32> to vector<64x64xf32>
    %cst_187 = arith.constant dense<0.000000e+00> : vector<16x64xf32>
    %174 = tpu.matmul %171, %173, %cst_187 {dimension_numbers = #tpu.dot_dimension_numbers<[1], [0], [0], [1], [0, 0, 1, 1], [], []>} : vector<16x64xf32>, vector<64x64xf32>, vector<16x64xf32> -> vector<16x64xf32>
    %175 = arith.addf %168, %174 : vector<16x64xf32>
    %c2_188 = arith.constant 2 : index
    %c0_189 = arith.constant 0 : index
    %c0_190 = arith.constant 0 : index
    %176 = vector.load %arg17[%c2_188, %c0_189, %c0_190] : memref<3x16x16xf32, #tpu.memory_space<vmem>>, vector<1x16x16xf32>
    %177 = vector.shape_cast %176 : vector<1x16x16xf32> to vector<16x16xf32>
    %cst_191 = arith.constant dense<0.000000e+00> : vector<16x64xf32>
    %178 = tpu.matmul %177, %162, %cst_191 {dimension_numbers = #tpu.dot_dimension_numbers<[1], [0], [0], [1], [0, 0, 1, 1], [], []>} : vector<16x16xf32>, vector<16x64xf32>, vector<16x64xf32> -> vector<16x64xf32>
    %c2_192 = arith.constant 2 : index
    %c0_193 = arith.constant 0 : index
    %c0_194 = arith.constant 0 : index
    %179 = vector.load %arg22[%c2_192, %c0_193, %c0_194] : memref<3x64x64xf32, #tpu.memory_space<vmem>>, vector<1x64x64xf32>
    %180 = vector.shape_cast %179 : vector<1x64x64xf32> to vector<64x64xf32>
    %cst_195 = arith.constant dense<0.000000e+00> : vector<16x64xf32>
    %181 = tpu.matmul %178, %180, %cst_195 {dimension_numbers = #tpu.dot_dimension_numbers<[1], [0], [0], [1], [0, 0, 1, 1], [], []>} : vector<16x64xf32>, vector<64x64xf32>, vector<16x64xf32> -> vector<16x64xf32>
    %182 = arith.addf %175, %181 : vector<16x64xf32>
    %c0_196 = arith.constant 0 : index
    %c0_197 = arith.constant 0 : index
    %183 = vector.load %arg23[%c0_196, %c0_197] : memref<1x64xf32, #tpu.memory_space<vmem>>, vector<1x64xf32>
    %184 = vector.broadcast %183 : vector<1x64xf32> to vector<16x64xf32>
    %185 = arith.addf %182, %184 : vector<16x64xf32>
    %c0_198 = arith.constant 0 : index
    %c0_199 = arith.constant 0 : index
    %c0_200 = arith.constant 0 : index
    %186 = vector.load %arg24[%c0_198, %c0_199, %c0_200] : memref<1x16x64xf32, #tpu.memory_space<vmem>>, vector<1x16x64xf32>
    %187 = vector.shape_cast %186 : vector<1x16x64xf32> to vector<16x64xf32>
    %188 = vector.shape_cast %185 : vector<16x64xf32> to vector<1x16x64xf32>
    tpu.vector_store %arg24[%c0_198, %c0_199, %c0_200], %188 {strides = array<i32>} : memref<1x16x64xf32, #tpu.memory_space<vmem>>, vector<1x16x64xf32>,
    return
  }
  func.func @transform_0(%arg0: i32) -> (i32, i32, i32) {
    %c0_i32 = arith.constant 0 : i32
    %c0_i32_0 = arith.constant 0 : i32
    %c0_i32_1 = arith.constant 0 : i32
    return %arg0, %c0_i32, %c0_i32_0 : i32, i32, i32
  }
  func.func @transform_1(%arg0: i32) -> (i32, i32, i32) {
    %c0_i32 = arith.constant 0 : i32
    %c0_i32_0 = arith.constant 0 : i32
    %c0_i32_1 = arith.constant 0 : i32
    %c0_i32_2 = arith.constant 0 : i32
    return %c0_i32, %c0_i32_0, %c0_i32_1 : i32, i32, i32
  }
  func.func @transform_2(%arg0: i32) -> (i32, i32, i32) {
    %c0_i32 = arith.constant 0 : i32
    %c0_i32_0 = arith.constant 0 : i32
    %c0_i32_1 = arith.constant 0 : i32
    %c0_i32_2 = arith.constant 0 : i32
    return %c0_i32, %c0_i32_0, %c0_i32_1 : i32, i32, i32
  }
  func.func @transform_3(%arg0: i32) -> (i32, i32) {
    %c0_i32 = arith.constant 0 : i32
    %c0_i32_0 = arith.constant 0 : i32
    %c0_i32_1 = arith.constant 0 : i32
    return %c0_i32, %c0_i32_0 : i32, i32
  }
  func.func @transform_4(%arg0: i32) -> (i32, i32, i32) {
    %c0_i32 = arith.constant 0 : i32
    %c0_i32_0 = arith.constant 0 : i32
    %c0_i32_1 = arith.constant 0 : i32
    %c0_i32_2 = arith.constant 0 : i32
    return %c0_i32, %c0_i32_0, %c0_i32_1 : i32, i32, i32
  }
  func.func @transform_5(%arg0: i32) -> (i32, i32, i32) {
    %c0_i32 = arith.constant 0 : i32
    %c0_i32_0 = arith.constant 0 : i32
    %c0_i32_1 = arith.constant 0 : i32
    %c0_i32_2 = arith.constant 0 : i32
    return %c0_i32, %c0_i32_0, %c0_i32_1 : i32, i32, i32
  }
  func.func @transform_6(%arg0: i32) -> (i32, i32) {
    %c0_i32 = arith.constant 0 : i32
    %c0_i32_0 = arith.constant 0 : i32
    %c0_i32_1 = arith.constant 0 : i32
    return %c0_i32, %c0_i32_0 : i32, i32
  }
  func.func @transform_7(%arg0: i32) -> (i32, i32, i32) {
    %c0_i32 = arith.constant 0 : i32
    %c0_i32_0 = arith.constant 0 : i32
    %c0_i32_1 = arith.constant 0 : i32
    %c0_i32_2 = arith.constant 0 : i32
    return %c0_i32, %c0_i32_0, %c0_i32_1 : i32, i32, i32
  }
  func.func @transform_8(%arg0: i32) -> (i32, i32, i32) {
    %c0_i32 = arith.constant 0 : i32
    %c0_i32_0 = arith.constant 0 : i32
    %c0_i32_1 = arith.constant 0 : i32
    %c0_i32_2 = arith.constant 0 : i32
    return %c0_i32, %c0_i32_0, %c0_i32_1 : i32, i32, i32
  }
  func.func @transform_9(%arg0: i32) -> (i32, i32) {
    %c0_i32 = arith.constant 0 : i32
    %c0_i32_0 = arith.constant 0 : i32
    %c0_i32_1 = arith.constant 0 : i32
    return %c0_i32, %c0_i32_0 : i32, i32
  }
  func.func @transform_10(%arg0: i32) -> (i32, i32, i32) {
    %c0_i32 = arith.constant 0 : i32
    %c0_i32_0 = arith.constant 0 : i32
    %c0_i32_1 = arith.constant 0 : i32
    %c0_i32_2 = arith.constant 0 : i32
    return %c0_i32, %c0_i32_0, %c0_i32_1 : i32, i32, i32
  }
  func.func @transform_11(%arg0: i32) -> (i32, i32, i32) {
    %c0_i32 = arith.constant 0 : i32
    %c0_i32_0 = arith.constant 0 : i32
    %c0_i32_1 = arith.constant 0 : i32
    %c0_i32_2 = arith.constant 0 : i32
    return %c0_i32, %c0_i32_0, %c0_i32_1 : i32, i32, i32
  }
  func.func @transform_12(%arg0: i32) -> (i32, i32) {
    %c0_i32 = arith.constant 0 : i32
    %c0_i32_0 = arith.constant 0 : i32
    %c0_i32_1 = arith.constant 0 : i32
    return %c0_i32, %c0_i32_0 : i32, i32
  }
  func.func @transform_13(%arg0: i32) -> (i32, i32, i32) {
    %c0_i32 = arith.constant 0 : i32
    %c0_i32_0 = arith.constant 0 : i32
    %c0_i32_1 = arith.constant 0 : i32
    %c0_i32_2 = arith.constant 0 : i32
    return %c0_i32, %c0_i32_0, %c0_i32_1 : i32, i32, i32
  }
  func.func @transform_14(%arg0: i32) -> (i32, i32, i32) {
    %c0_i32 = arith.constant 0 : i32
    %c0_i32_0 = arith.constant 0 : i32
    %c0_i32_1 = arith.constant 0 : i32
    %c0_i32_2 = arith.constant 0 : i32
    return %c0_i32, %c0_i32_0, %c0_i32_1 : i32, i32, i32
  }
  func.func @transform_15(%arg0: i32) -> (i32, i32) {
    %c0_i32 = arith.constant 0 : i32
    %c0_i32_0 = arith.constant 0 : i32
    %c0_i32_1 = arith.constant 0 : i32
    return %c0_i32, %c0_i32_0 : i32, i32
  }
  func.func @transform_16(%arg0: i32) -> (i32, i32, i32) {
    %c0_i32 = arith.constant 0 : i32
    %c0_i32_0 = arith.constant 0 : i32
    %c0_i32_1 = arith.constant 0 : i32
    %c0_i32_2 = arith.constant 0 : i32
    return %c0_i32, %c0_i32_0, %c0_i32_1 : i32, i32, i32
  }
  func.func @transform_17(%arg0: i32) -> (i32, i32, i32) {
    %c0_i32 = arith.constant 0 : i32
    %c0_i32_0 = arith.constant 0 : i32
    %c0_i32_1 = arith.constant 0 : i32
    %c0_i32_2 = arith.constant 0 : i32
    return %c0_i32, %c0_i32_0, %c0_i32_1 : i32, i32, i32
  }
  func.func @transform_18(%arg0: i32) -> (i32, i32) {
    %c0_i32 = arith.constant 0 : i32
    %c0_i32_0 = arith.constant 0 : i32
    %c0_i32_1 = arith.constant 0 : i32
    return %c0_i32, %c0_i32_0 : i32, i32
  }
  func.func @transform_19(%arg0: i32) -> (i32, i32, i32) {
    %c0_i32 = arith.constant 0 : i32
    %c0_i32_0 = arith.constant 0 : i32
    %c0_i32_1 = arith.constant 0 : i32
    %c0_i32_2 = arith.constant 0 : i32
    return %c0_i32, %c0_i32_0, %c0_i32_1 : i32, i32, i32
  }
  func.func @transform_20(%arg0: i32) -> (i32, i32) {
    %c0_i32 = arith.constant 0 : i32
    %c0_i32_0 = arith.constant 0 : i32
    %c0_i32_1 = arith.constant 0 : i32
    return %c0_i32, %c0_i32_0 : i32, i32
  }
  func.func @transform_21(%arg0: i32) -> (i32, i32, i32) {
    %c0_i32 = arith.constant 0 : i32
    %c0_i32_0 = arith.constant 0 : i32
    %c0_i32_1 = arith.constant 0 : i32
    %c0_i32_2 = arith.constant 0 : i32
    return %c0_i32, %c0_i32_0, %c0_i32_1 : i32, i32, i32
  }
  func.func @transform_22(%arg0: i32) -> (i32, i32) {
    %c0_i32 = arith.constant 0 : i32
    %c0_i32_0 = arith.constant 0 : i32
    %c0_i32_1 = arith.constant 0 : i32
    return %c0_i32, %c0_i32_0 : i32, i32
  }
  func.func @transform_23(%arg0: i32) -> (i32, i32, i32) {
    %c0_i32 = arith.constant 0 : i32
    %c0_i32_0 = arith.constant 0 : i32
    %c0_i32_1 = arith.constant 0 : i32
    return %arg0, %c0_i32, %c0_i32_0 : i32, i32, i32
  }
}

</mosaic_0001>

<bundles_post_ra>
// kernel: segm_head_forward.1
= control target key start
LH: loop header
LB: loop body
LE: loop exit
PB: predicated region body
PF: predicated region fallthrough
CT: control target
= control target key end

     0   :  { %s6481_s0 = inlined_call_operand.vmem [shape: f32[2,16,64], index: 0, kind: input, shape index: {}]   ;;  %s6482_s1 = inlined_call_operand.vmem [shape: f32[2,8,16], index: 1, kind: input, shape index: {}]   ;;  %s6483_s2 = inlined_call_operand.vmem [shape: f32[2,64,64], index: 2, kind: input, shape index: {}]   ;;  %s6484_s3 = inlined_call_operand.vmem [shape: f32[1,64], index: 3, kind: input, shape index: {}]   ;;  %s6485_s4 = inlined_call_operand.vmem [shape: f32[2,4,8], index: 4, kind: input, shape index: {}]   ;;  %s6486_s5 = inlined_call_operand.vmem [shape: f32[2,64,32], index: 5, kind: input, shape index: {}]   ;;  %s6487_s6 = inlined_call_operand.vmem [shape: f32[1,32], index: 6, kind: input, shape index: {}]   ;;  %s6488_s7 = inlined_call_operand.vmem [shape: f32[3,8,4], index: 7, kind: input, shape index: {}]   ;;  %s6489_s8 = inlined_call_operand.vmem [shape: f32[3,32,32], index: 8, kind: input, shape index: {}]   ;;  %s6490_s9 = inlined_call_operand.vmem [shape: f32[1,32], index: 9, kind: input, shape index: {}]   ;;  %s6491_s10 = inlined_call_operand.vmem [shape: f32[3,8,8], index: 10, kind: input, shape index: {}]   ;;  %s6492_s11 = inlined_call_operand.vmem [shape: f32[3,32,64], index: 11, kind: input, shape index: {}]   ;;  %s6493_s12 = inlined_call_operand.vmem [shape: f32[1,64], index: 12, kind: input, shape index: {}]   ;;  %s6494_s13 = inlined_call_operand.vmem [shape: f32[3,16,8], index: 13, kind: input, shape index: {}]   ;;  %s6495_s14 = inlined_call_operand.vmem [shape: f32[3,64,64], index: 14, kind: input, shape index: {}]   ;;  %s6496_s15 = inlined_call_operand.vmem [shape: f32[1,64], index: 15, kind: input, shape index: {}]   ;;  %s6497_s16 = inlined_call_operand.vmem [shape: f32[3,16,16], index: 16, kind: input, shape index: {}]   ;;  %s6498_s17 = inlined_call_operand.vmem [shape: f32[3,64,128], index: 17, kind: input, shape index: {}]   ;;  %s6499_s18 = inlined_call_operand.vmem [shape: f32[1,128], index: 18, kind: input, shape index: {}]   ;;  %s6500_s19 = inlined_call_operand.vmem [shape: f32[3,128,64], index: 19, kind: input, shape index: {}]   ;;  %s6501_s20 = inlined_call_operand.vmem [shape: f32[1,64], index: 20, kind: input, shape index: {}]   ;;  %s6502_s21 = inlined_call_operand.vmem [shape: f32[3,64,64], index: 21, kind: input, shape index: {}]   ;;  %s6503_s22 = inlined_call_operand.vmem [shape: f32[1,64], index: 22, kind: input, shape index: {}]   ;;  %s6504_s23 = inlined_call_operand.vmem [shape: f32[2,16,64], index: 23, kind: output, shape index: {}]  }
   0x1   :  { %6511 = sst [smem:[#allocation2_spill]] %s6481_s0 }
   0x2   :  { %6512 = sst [smem:[#allocation3_spill]] %s6482_s1 }
   0x3   :  { %6513 = sst [smem:[#allocation4_spill]] %s6483_s2 }
   0x4   :  { %6514 = sst [smem:[#allocation5_spill]] %s6484_s3 }
   0x5   :  { %6515 = sst [smem:[#allocation6_spill]] %s6485_s4  ;;  %s5618_s4 = smov 0  }
   0x6   :  { %6516 = sst [smem:[#allocation7_spill]] %s6486_s5 }
   0x7   :  { %6517 = sst [smem:[#allocation8_spill]] %s6487_s6 }
   0x8   :  { %6518 = sst [smem:[#allocation9_spill]] %s6488_s7 }
   0x9 LB: > { %s4439_s30 = sadd.s32 4294967295, %s5494_s4   ;;  %p4443_p0 = scmp.ge.s32.totalorder %s5494_s4, 1  ;;  %s5494_s4 = sphi %s5618_s4, %s33_s4  }
   0xa   : > { %p637_p1 = scmp.lt.s32.totalorder %s5494_s4, 3 }
   0xc   : > { %p638_p2 = pnand %p4443_p0, %p637_p1 }
   0xd   : > { %p701_p3 = scmp.lt.s32.totalorder (!%p638_p2), %s4439_s30, 1  ;;  %s6519_s5 = sld [smem:[#allocation4_spill]] (!%p638_p2) }
   0xe   : > { %641 = sbr.rel (%p638_p2) target bundleno = 4229 (0x1085), region = 112  ;;  %s6520_s29 = sld [smem:[#allocation2_spill]] (!%p638_p2) }
   0xf   : > { %s6521_s26 = sld [smem:[#allocation3_spill]] (!%p638_p2) }
  0x10   : > { %s6522_s25 = sld [smem:[#allocation5_spill]] (!%p638_p2) }
  0x11   : > { %s6523_s27 = sld [smem:[#allocation6_spill]] (!%p638_p2) }
  0x12   : > { %s6525_s7 = sld [smem:[#allocation8_spill]] (!%p638_p2) }
  0x13   : > { %v5496_v0 = vmov 0.0   ;;  %vm5497_vm0 = vmmov 0   ;;  %v795_v1 = vld [vmem:[%s6519_s5 + $0x38] sm:$0xff]  ;;  %s6529_s30 = smov (!%p701_p3, %s4439_s30), 1  ;;  %v794_v2 = vld [vmem:[%s6519_s5 + $0x30] sm:$0xff]  ;;  %v793_v3 = vld [vmem:[%s6519_s5 + $0x28] sm:$0xff] }
  0x14   : > { %4928 = vmatprep.subr.mxu0 %v5496_v0  ;;  %4932 = vmatprep.mubr.msk.f32.mxu0 %vm5497_vm0, %v5496_v0  ;;  %s6510_s2 = sshll.u32 %s6529_s30, 4  ;;  %v792_v6 = vld [vmem:[%s6519_s5 + $0x20] sm:$0xff]  ;;  %vm714_vm1 = vcmask 130048   ;;  %v791_v8 = vld [vmem:[%s6519_s5 + $0x18] sm:$0xff]  ;;  %v790_v11 = vld [vmem:[%s6519_s5 + $0x10] sm:$0xff]  ;;  %vm880_vm2 = vcmask 523264  }
  0x15   : > { %4961 = vmatprep.subr.mxu1 %v5496_v0  ;;  %4977 = vmatprep.mubr.msk.f32.mxu1 %vm5497_vm0, %v5496_v0  ;;  %s705_s3 = scalar_lea.vmem %s6520_s29, %s6510_s2  ;;  %v713_v7 = vld [vmem:[%s6521_s26] sm:$0xff]  ;;  %v4449_v9 = vld [vmem:[%s6521_s26 + $0x8] sm:$0xff]  ;;  %v4458_v10 = vld [vmem:[%s6519_s5 + $0x78] sm:$0xff]  ;;  %vm1037_vm3 = vcmask 64512   ;;  %s6524_s2 = sld [smem:[#allocation7_spill]]  ;;  %vm1363_vm4 = vcmask 1043456  }
  0x16   : > { %4962 = vmatpush3.msra.mxu1 %v795_v1  ;;  %v712_v4 = vld [vmem:[%s705_s3 + $0x8] sm:$0xff]  ;;  %v711_v5 = vld [vmem:[%s705_s3] sm:$0xff]  ;;  %v4457_v12 = vld [vmem:[%s6519_s5 + $0x70] sm:$0xff]  ;;  %s6526_s3 = sld [smem:[#allocation9_spill]]  ;;  %vm1359_vm5 = vcmask 31744   ;;  %vm1521_vm6 = vcmask 261120  }
  0x17   : > { %4963 = vmatprep.subr.mxu1 %v5496_v0  ;;  %4929 = vmatpush3.msra.mxu0 %v712_v4  ;;  %v789_v13 = vld [vmem:[%s6519_s5 + $0x8] sm:$0xff]  ;;  %v4455_v15 = vld [vmem:[%s6519_s5 + $0x60] sm:$0xff]  ;;  %v4454_v16 = vld [vmem:[%s6519_s5 + $0x58] sm:$0xff]  ;;  %s6527_s28 = sshll.u32 %s6529_s30, 4 }
  0x18   : > { %4964 = vmatpush3.msra.mxu1 %v794_v2  ;;  %4930 = vmatprep.subr.mxu0 %v5496_v0  ;;  %v4456_v14 = vld [vmem:[%s6519_s5 + $0x68] sm:$0xff]  ;;  %v4453_v17 = vld [vmem:[%s6519_s5 + $0x50] sm:$0xff]  ;;  %v788_v18 = vld [vmem:[%s6519_s5] sm:$0xff]  ;;  %s710_s24 = scalar_lea.vmem %s6504_s23, %s6527_s28 }
  0x19   : > { %4965 = vmatprep.subr.mxu1 %v5496_v0  ;;  %4931 = vmatpush3.msra.mxu0 %v711_v5  ;;  %v4452_v19 = vld [vmem:[%s6519_s5 + $0x48] sm:$0xff]  ;;  %v4451_v20 = vld [vmem:[%s6519_s5 + $0x40] sm:$0xff]  ;;  %v4484_v2 = vld [vmem:[%s6489_s8 + $0x38] sm:$0xff] }
  0x1a   : > { %4966 = vmatpush3.msra.mxu1 %v793_v3  ;;  %4933 = vmatmul.mubr.msk.f32.vlgmr.msra.gmra.mxu0 %vm714_vm1, %v713_v7  ;;  %v4461_v28 = vld [vmem:[%s6522_s25] ss:$0 sm:$0xff]  ;;  %v4463_v34 = vld [vmem:[%s6523_s27 + $0x4] sm:$0xf]  ;;  %v1440_v3 = vld [vmem:[%s6489_s8 + $0x18] sm:$0xff] }
  0x1b   : > { %4967 = vmatprep.subr.mxu1 %v5496_v0  ;;  %4935 = vmatprep.subr.mxu0 %v5496_v0  ;;  %v1036_v33 = vld [vmem:[%s6523_s27] sm:$0xf]  ;;  %v4472_v35 = vld [vmem:[%s6524_s2 + $0x78] sm:$0xff]  ;;  %v4471_v37 = vld [vmem:[%s6524_s2 + $0x70] sm:$0xff] }
  0x1c   : > { %4968 = vmatpush3.msra.mxu1 %v792_v6  ;;  %4936 = vmatpush3.msra.mxu0 %v712_v4  ;;  %v1118_v36 = vld [vmem:[%s6524_s2 + $0x38] sm:$0xff]  ;;  %v1117_v38 = vld [vmem:[%s6524_s2 + $0x30] sm:$0xff]  ;;  %v4470_v39 = vld [vmem:[%s6524_s2 + $0x68] sm:$0xff] }
  0x1d   : > { %4939 = vmatprep.mubr.msk.f32.mxu0 %vm5497_vm0, %v5496_v0  ;;  %4937 = vmatprep.subr.mxu0 %v5496_v0  ;;  %v1116_v40 = vld [vmem:[%s6524_s2 + $0x28] sm:$0xff]  ;;  %v4469_v41 = vld [vmem:[%s6524_s2 + $0x60] sm:$0xff]  ;;  %v4468_v43 = vld [vmem:[%s6524_s2 + $0x58] sm:$0xff] }
  0x1e   : > { %4969 = vmatprep.subr.mxu1 %v5496_v0  ;;  %4938 = vmatpush3.msra.mxu0 %v711_v5  ;;  %v1115_v42 = vld [vmem:[%s6524_s2 + $0x20] sm:$0xff]  ;;  %v1114_v44 = vld [vmem:[%s6524_s2 + $0x18] sm:$0xff]  ;;  %v4467_v45 = vld [vmem:[%s6524_s2 + $0x50] sm:$0xff] }
  0x1f   : > { %4970 = vmatpush3.msra.mxu1 %v791_v8  ;;  %4940 = vmatmul.mubr.msk.f32.vlgmr.msra.gmra.mxu0 %vm714_vm1, %v4449_v9  ;;  %v1113_v46 = vld [vmem:[%s6524_s2 + $0x10] sm:$0xff]  ;;  %v4466_v47 = vld [vmem:[%s6524_s2 + $0x48] sm:$0xff]  ;;  %v4465_v49 = vld [vmem:[%s6524_s2 + $0x40] sm:$0xff] }
  0x20   : > { %4942 = vmatprep.subr.mxu0 %v5496_v0  ;;  %4971 = vmatprep.subr.mxu1 %v5496_v0  ;;  %v1112_v48 = vld [vmem:[%s6524_s2 + $0x8] sm:$0xff]  ;;  %v1111_v50 = vld [vmem:[%s6524_s2] sm:$0xff]  ;;  %v4483_v4 = vld [vmem:[%s6489_s8 + $0x30] sm:$0xff] }
  0x21   : > { %4943 = vmatpush3.msra.mxu0 %v4458_v10  ;;  %4972 = vmatpush3.msra.mxu1 %v790_v11  ;;  %v4475_v57 = vld [vmem:[%s6525_s7] ss:$0 sm:$0xff]  ;;  %v4478_v1 = vld [vmem:[%s6526_s3 + $0x8] sm:$0xff]  ;;  %v1439_v5 = vld [vmem:[%s6489_s8 + $0x10] sm:$0xff] }
  0x22   : > { %4944 = vmatprep.subr.mxu0 %v5496_v0  ;;  %4973 = vmatprep.subr.mxu1 %v5496_v0  ;;  %v1358_v63 = vld [vmem:[%s6526_s3] sm:$0xff]  ;;  %v4482_v6 = vld [vmem:[%s6489_s8 + $0x28] sm:$0xff] }
  0x23   : > { %4945 = vmatpush3.msra.mxu0 %v4457_v12  ;;  %4974 = vmatpush3.msra.mxu1 %v789_v13  ;;  %v1438_v7 = vld [vmem:[%s6489_s8 + $0x8] sm:$0xff]  ;;  %v4481_v8 = vld [vmem:[%s6489_s8 + $0x20] sm:$0xff]  ;;  %v4493_v12 = vld [vmem:[%s6489_s8 + $0x58] sm:$0xff] }
  0x24   : > { %4946 = vmatprep.subr.mxu0 %v5496_v0  ;;  %4975 = vmatprep.subr.mxu1 %v5496_v0  ;;  %v1437_v9 = vld [vmem:[%s6489_s8] sm:$0xff] }
  0x25   : > { %4947 = vmatpush3.msra.mxu0 %v4456_v14  ;;  %4958 = vmatprep.mubr.msk.f32.mxu0 %vm5497_vm0, %v5496_v0  ;;  %v4487_v14 = vld [vmem:[%s6526_s3 + $0x10] sm:$0xff] }
  0x26   : > { %4948 = vmatprep.subr.mxu0 %v5496_v0  ;;  %4976 = vmatpush3.msra.mxu1 %v788_v18  ;;  %v4490_v18 = vld [vmem:[%s6489_s8 + $0x40] sm:$0xff] }
  0x27   : > { %4949 = vmatpush3.msra.mxu0 %v4455_v15  ;;  %4985 = vmatprep.subr.mxu1 %v5496_v0 }
  0x28   : > { %4950 = vmatprep.subr.mxu0 %v5496_v0 }
  0x29   : > { %4951 = vmatpush3.msra.mxu0 %v4454_v16  ;;  %v4492_v16 = vld [vmem:[%s6489_s8 + $0x50] sm:$0xff] }
  0x2a   : > { %4952 = vmatprep.subr.mxu0 %v5496_v0 }
  0x2b   : > { %4953 = vmatpush3.msra.mxu0 %v4453_v17  ;;  %v4491_v17 = vld [vmem:[%s6489_s8 + $0x48] sm:$0xff] }
  0x2c   : > { %4954 = vmatprep.subr.mxu0 %v5496_v0 }
  0x2d   : > { %4955 = vmatpush3.msra.mxu0 %v4452_v19 }
  0x2e   : > { %4956 = vmatprep.subr.mxu0 %v5496_v0 }
  0x2f   : > { %4957 = vmatpush3.msra.mxu0 %v4451_v20 }
  0x30   : > { %4980 = vmatprep.subr.mxu0 %v5496_v0 }
  0xda   : > { %v784_v21 = vpop.f32.mrf.mxu0 }
  0xdb   : > { %4978 = vmatmul.mubr.msk.f32.vlgmr.msra.gmra.mxu1 %vm880_vm2, %v784_v21 }
  0xdc   : > { %v4934_v22 = vpop.f32.mrf.mxu0  ;;  %4987 = vmatprep.mubr.msk.f32.mxu1 %vm5497_vm0, %v5496_v0 }
  0xdf   : > { %v867_v23 = vpop.f32.mrf.mxu0 }
  0xe0   : > { %4959 = vmatmul.mubr.msk.f32.vlgmr.msra.gmra.mxu0 %vm880_vm2, %v867_v23 }
  0xe1   : > { %v4941_v24 = vpop.f32.mrf.mxu0  ;;  %4982 = vmatprep.mubr.msk.f32.mxu0 %vm5497_vm0, %v5496_v0 }
 0x19b   : > { %v1023_v25 = vpop.f32.mrf.mxu1 }
 0x19d   : > { %v4979_v26 = vpop.f32.mrf.mxu1 }
 0x19e   : > { %v4502_v26 = vld [vmem:[%s6492_s11 + $0x38] sm:$0xff] }
 0x1a0   : > { %v950_v27 = vpop.f32.mrf.mxu0 }
 0x1a1   : > { %v1024_v29 = vadd.f32 %v1023_v25, %v950_v27  ;;  %v4501_v27 = vld [vmem:[%s6492_s11 + $0x30] sm:$0xff] }
 0x1a2   : > { %v4960_v30 = vpop.f32.mrf.mxu0 }
 0x1a3   : > { %v1034_v31 = vadd.f32 %v4461_v28, %v1024_v29  ;;  %v4495_v29 = vld [vmem:[%s6490_s9] ss:$0 sm:$0xff] }
 0x1a5   : > { %v1035_v32 = vmax.f32 %v1034_v31, 0.0 }
 0x1a7   : > { %4981 = vmatpush3.msra.mxu0 %v1035_v32  ;;  %4986 = vmatpush3.msra.mxu1 %v1035_v32 }
 0x1a8   : > { %4983 = vmatmul.mubr.msk.f32.vlgmr.msra.gmra.mxu0 %vm1037_vm3, %v1036_v33  ;;  %4988 = vmatmul.mubr.msk.f32.vlgmr.msra.gmra.mxu1 %vm1037_vm3, %v4463_v34  ;;  %v1831_v34 = vld [vmem:[%s6491_s10] sm:$0xff] }
 0x1a9   : > { %4990 = vmatprep.subr.mxu0 %v5496_v0  ;;  %5009 = vmatprep.subr.mxu1 %v5496_v0 }
 0x1aa   : > { %4991 = vmatpush3.msra.mxu0 %v4472_v35  ;;  %5010 = vmatpush3.msra.mxu1 %v1118_v36  ;;  %v4497_v35 = vld [vmem:[%s6491_s10 + $0x8] sm:$0xff]  ;;  %v1908_v36 = vld [vmem:[%s6492_s11 + $0x18] sm:$0xff] }
 0x1ab   : > { %4992 = vmatprep.subr.mxu0 %v5496_v0  ;;  %5011 = vmatprep.subr.mxu1 %v5496_v0 }
 0x1ac   : > { %4993 = vmatpush3.msra.mxu0 %v4471_v37  ;;  %5012 = vmatpush3.msra.mxu1 %v1117_v38  ;;  %v1907_v37 = vld [vmem:[%s6492_s11 + $0x10] sm:$0xff]  ;;  %v1906_v38 = vld [vmem:[%s6492_s11 + $0x8] sm:$0xff] }
 0x1ad   : > { %4994 = vmatprep.subr.mxu0 %v5496_v0  ;;  %5013 = vmatprep.subr.mxu1 %v5496_v0 }
 0x1ae   : > { %4995 = vmatpush3.msra.mxu0 %v4470_v39  ;;  %5014 = vmatpush3.msra.mxu1 %v1116_v40  ;;  %v1905_v39 = vld [vmem:[%s6492_s11] sm:$0xff]  ;;  %v4500_v40 = vld [vmem:[%s6492_s11 + $0x28] sm:$0xff] }
 0x1af   : > { %4996 = vmatprep.subr.mxu0 %v5496_v0  ;;  %5015 = vmatprep.subr.mxu1 %v5496_v0 }
 0x1b0   : > { %4997 = vmatpush3.msra.mxu0 %v4469_v41  ;;  %5016 = vmatpush3.msra.mxu1 %v1115_v42  ;;  %v4499_v41 = vld [vmem:[%s6492_s11 + $0x20] sm:$0xff] }
 0x1b1   : > { %4998 = vmatprep.subr.mxu0 %v5496_v0  ;;  %5017 = vmatprep.subr.mxu1 %v5496_v0 }
 0x1b2   : > { %4999 = vmatpush3.msra.mxu0 %v4468_v43  ;;  %5018 = vmatpush3.msra.mxu1 %v1114_v44 }
 0x1b3   : > { %5000 = vmatprep.subr.mxu0 %v5496_v0  ;;  %5019 = vmatprep.subr.mxu1 %v5496_v0 }
 0x1b4   : > { %5001 = vmatpush3.msra.mxu0 %v4467_v45  ;;  %5020 = vmatpush3.msra.mxu1 %v1113_v46  ;;  %v4505_v46 = vld [vmem:[%s6491_s10 + $0x10] sm:$0xff] }
 0x1b5   : > { %5002 = vmatprep.subr.mxu0 %v5496_v0  ;;  %5021 = vmatprep.subr.mxu1 %v5496_v0 }
 0x1b6   : > { %5003 = vmatpush3.msra.mxu0 %v4466_v47  ;;  %5022 = vmatpush3.msra.mxu1 %v1112_v48  ;;  %v4510_v47 = vld [vmem:[%s6492_s11 + $0x58] sm:$0xff]  ;;  %v4509_v48 = vld [vmem:[%s6492_s11 + $0x50] sm:$0xff] }
 0x1b7   : > { %5004 = vmatprep.subr.mxu0 %v5496_v0  ;;  %5023 = vmatprep.subr.mxu1 %v5496_v0 }
 0x1b8   : > { %5006 = vmatprep.mubr.msk.f32.mxu0 %vm5497_vm0, %v5496_v0  ;;  %5025 = vmatprep.mubr.msk.f32.mxu1 %vm5497_vm0, %v5496_v0 }
 0x1b9   : > { %5005 = vmatpush3.msra.mxu0 %v4465_v49  ;;  %5024 = vmatpush3.msra.mxu1 %v1111_v50  ;;  %v4508_v49 = vld [vmem:[%s6492_s11 + $0x48] sm:$0xff]  ;;  %v4507_v50 = vld [vmem:[%s6492_s11 + $0x40] sm:$0xff] }
 0x1ba   : > { %5028 = vmatprep.subr.mxu0 %v5496_v0  ;;  %5033 = vmatprep.subr.mxu1 %v5496_v0 }
 0x268   : > { %v1107_v51 = vpop.f32.mrf.mxu0  ;;  %v1190_v52 = vpop.f32.mrf.mxu1 }
 0x269   : > { %5007 = vmatmul.mubr.msk.f32.vlgmr.msra.gmra.mxu0 %vm880_vm2, %v1190_v52  ;;  %5026 = vmatmul.mubr.msk.f32.vlgmr.msra.gmra.mxu1 %vm880_vm2, %v1107_v51  ;;  %v4526_v51 = vld [vmem:[%s6495_s14 + $0x78] sm:$0xff] }
 0x26a   : > { %v4984_v53 = vpop.f32.mrf.mxu0  ;;  %v4989_v54 = vpop.f32.mrf.mxu1  ;;  %5030 = vmatprep.mubr.msk.f32.mxu0 %vm5497_vm0, %v5496_v0  ;;  %5035 = vmatprep.mubr.msk.f32.mxu1 %vm5497_vm0, %v5496_v0 }
 0x329   : > { %v1272_v55 = vpop.f32.mrf.mxu0  ;;  %v1345_v56 = vpop.f32.mrf.mxu1 }
 0x32a   : > { %v1346_v58 = vadd.f32 %v1345_v56, %v1272_v55 }
 0x32b   : > { %v5008_v59 = vpop.f32.mrf.mxu0  ;;  %v5027_v60 = vpop.f32.mrf.mxu1 }
 0x32c   : > { %v1356_v61 = vadd.f32 %v4475_v57, %v1346_v58  ;;  %v4524_v59 = vld [vmem:[%s6495_s14 + $0x68] sm:$0xff]  ;;  %v4523_v60 = vld [vmem:[%s6495_s14 + $0x60] sm:$0xff] }
 0x32e   : > { %v1357_v62 = vmax.f32 %v1356_v61, 0.0  ;;  %v4522_v61 = vld [vmem:[%s6495_s14 + $0x58] sm:$0xff] }
 0x330   : > { %5029 = vmatpush3.msk.msra.mxu0 %vm1363_vm4, %v1357_v62  ;;  %5034 = vmatpush3.msk.msra.mxu1 %vm1363_vm4, %v1357_v62 }
 0x331   : > { %5031 = vmatmul.mubr.msk.f32.vlgmr.msra.gmra.mxu0 %vm1359_vm5, %v1358_v63  ;;  %5036 = vmatmul.mubr.msk.f32.vlgmr.msra.gmra.mxu1 %vm1359_vm5, %v4478_v1  ;;  %v4520_v63 = vld [vmem:[%s6495_s14 + $0x48] sm:$0xff]  ;;  %v4519_v1 = vld [vmem:[%s6495_s14 + $0x40] sm:$0xff] }
 0x332   : > { %5038 = vmatprep.subr.mxu0 %v5496_v0  ;;  %5049 = vmatprep.subr.mxu1 %v5496_v0 }
 0x333   : > { %5039 = vmatpush3.msra.mxu0 %v4484_v2  ;;  %5050 = vmatpush3.msra.mxu1 %v1440_v3  ;;  %v2298_v2 = vld [vmem:[%s6494_s13] sm:$0xff] }
 0x334   : > { %5040 = vmatprep.subr.mxu0 %v5496_v0  ;;  %5051 = vmatprep.subr.mxu1 %v5496_v0 }
 0x335   : > { %5041 = vmatpush3.msra.mxu0 %v4483_v4  ;;  %5052 = vmatpush3.msra.mxu1 %v1439_v5  ;;  %v4512_v4 = vld [vmem:[%s6493_s12] ss:$0 sm:$0xff] }
 0x336   : > { %5042 = vmatprep.subr.mxu0 %v5496_v0  ;;  %5053 = vmatprep.subr.mxu1 %v5496_v0 }
 0x337   : > { %5043 = vmatpush3.msra.mxu0 %v4482_v6  ;;  %5054 = vmatpush3.msra.mxu1 %v1438_v7 }
 0x338   : > { %5044 = vmatprep.subr.mxu0 %v5496_v0  ;;  %5055 = vmatprep.subr.mxu1 %v5496_v0 }
 0x339   : > { %5045 = vmatpush3.msra.mxu0 %v4481_v8  ;;  %5046 = vmatprep.mubr.msk.f32.mxu0 %vm5497_vm0, %v5496_v0 }
 0x33a   : > { %5057 = vmatprep.mubr.msk.f32.mxu1 %vm5497_vm0, %v5496_v0  ;;  %5060 = vmatprep.subr.mxu0 %v5496_v0 }
 0x33b   : > { %5056 = vmatpush3.msra.mxu1 %v1437_v9  ;;  %v2299_v9 = vld [vmem:[%s6494_s13 + $0x8] sm:$0xff] }
 0x33c   : > { %5065 = vmatprep.subr.mxu1 %v5496_v0 }
 0x3f1   : > { %v1433_v10 = vpop.f32.mrf.mxu0  ;;  %v1512_v11 = vpop.f32.mrf.mxu1 }
 0x3f2   : > { %5047 = vmatmul.mubr.msk.f32.vlgmr.msra.gmra.mxu0 %vm1521_vm6, %v1512_v11  ;;  %5058 = vmatmul.mubr.msk.f32.vlgmr.msra.gmra.mxu1 %vm1521_vm6, %v1433_v10  ;;  %v4515_v10 = vld [vmem:[%s6494_s13 + $0x10] sm:$0xff]  ;;  %v2388_v11 = vld [vmem:[%s6495_s14 + $0x38] sm:$0xff] }
 0x3f3   : > { %5061 = vmatpush3.msk.msra.mxu0 %vm1363_vm4, %v1357_v62  ;;  %v5037_v13 = vpop.f32.mrf.mxu1  ;;  %5062 = vmatprep.mubr.msk.f32.mxu0 %vm5497_vm0, %v5496_v0  ;;  %v5032_v15 = vpop.f32.mrf.mxu0  ;;  %v4521_v62 = vld [vmem:[%s6495_s14 + $0x50] sm:$0xff] }
 0x3f4   : > { %5066 = vmatpush3.msra.mxu1 %v4493_v12  ;;  %5073 = vmatprep.mubr.msk.f32.mxu1 %vm5497_vm0, %v5496_v0  ;;  %v4516_v12 = vld [vmem:[%s6494_s13 + $0x18] sm:$0xff]  ;;  %v2387_v13 = vld [vmem:[%s6495_s14 + $0x30] sm:$0xff]  ;;  %v2385_v15 = vld [vmem:[%s6495_s14 + $0x20] sm:$0xff] }
 0x3f5   : > { %5067 = vmatprep.subr.mxu1 %v5496_v0  ;;  %5076 = vmatprep.subr.mxu0 %v5496_v0 }
 0x3f6   : > { %5063 = vmatmul.mubr.msk.f32.vlgmr.msra.gmra.mxu0 %vm1359_vm5, %v4487_v14  ;;  %5068 = vmatpush3.msra.mxu1 %v4492_v16  ;;  %v2386_v14 = vld [vmem:[%s6495_s14 + $0x28] sm:$0xff]  ;;  %v2384_v16 = vld [vmem:[%s6495_s14 + $0x18] sm:$0xff] }
 0x3f7   : > { %5078 = vmatprep.mubr.msk.f32.mxu0 %vm5497_vm0, %v5496_v0  ;;  %5069 = vmatprep.subr.mxu1 %v5496_v0 }
 0x3f8   : > { %5070 = vmatpush3.msra.mxu1 %v4491_v17  ;;  %v2383_v17 = vld [vmem:[%s6495_s14 + $0x10] sm:$0xff] }
 0x3f9   : > { %5071 = vmatprep.subr.mxu1 %v5496_v0 }
 0x3fa   : > { %5072 = vmatpush3.msra.mxu1 %v4490_v18  ;;  %v2382_v18 = vld [vmem:[%s6495_s14 + $0x8] sm:$0xff] }
 0x3fb   : > { %5086 = vmatprep.subr.mxu1 %v5496_v0 }
 0x4b2   : > { %v1591_v19 = vpop.f32.mrf.mxu0  ;;  %v1664_v20 = vpop.f32.mrf.mxu1 }
 0x4b3   : > { %v1665_v21 = vadd.f32 %v1664_v20, %v1591_v19  ;;  %v2381_v19 = vld [vmem:[%s6495_s14] sm:$0xff]  ;;  %v4542_v20 = vld [vmem:[%s6495_s14 + $0xb8] sm:$0xff] }
 0x4b4   : > { %v5048_v22 = vpop.f32.mrf.mxu0  ;;  %v5059_v23 = vpop.f32.mrf.mxu1 }
 0x4b5   : > { %v4541_v23 = vld [vmem:[%s6495_s14 + $0xb0] sm:$0xff] }
 0x4b6   : > { %v1739_v24 = vpop.f32.mrf.mxu0 }
 0x4b7   : > { %5074 = vmatmul.mubr.msk.f32.vlgmr.msra.gmra.mxu1 %vm1521_vm6, %v1739_v24 }
 0x4b8   : > { %v5064_v25 = vpop.f32.mrf.mxu0  ;;  %5094 = vmatprep.mubr.msk.f32.mxu1 %vm5497_vm0, %v5496_v0  ;;  %5087 = vmatpush3.msra.mxu1 %v4502_v26  ;;  %v4531_v26 = vld [vmem:[%s6494_s13 + $0x20] sm:$0xff] }
 0x4b9   : > { %5088 = vmatprep.subr.mxu1 %v5496_v0 }
 0x4ba   : > { %5089 = vmatpush3.msra.mxu1 %v4501_v27  ;;  %v4532_v27 = vld [vmem:[%s6494_s13 + $0x28] sm:$0xff] }
 0x4bb   : > { %5090 = vmatprep.subr.mxu1 %v5496_v0 }
 0x4bc   : > { %5091 = vmatpush3.msra.mxu1 %v4500_v40  ;;  %v2920_v40 = vld [vmem:[%s6498_s17 + $0x30] sm:$0xff] }
 0x4bd   : > { %5092 = vmatprep.subr.mxu1 %v5496_v0 }
 0x4be   : > { %5093 = vmatpush3.msra.mxu1 %v4499_v41  ;;  %v2919_v41 = vld [vmem:[%s6498_s17 + $0x28] sm:$0xff] }
 0x4bf   : > { %5108 = vmatprep.subr.mxu1 %v5496_v0 }
 0x577   : > { %v1817_v28 = vpop.f32.mrf.mxu1 }
 0x578   : > { %v1821_v30 = vadd.f32 %v1817_v28, %v1665_v21  ;;  %v4540_v28 = vld [vmem:[%s6495_s14 + $0xa8] sm:$0xff] }
 0x579   : > { %v5075_v31 = vpop.f32.mrf.mxu1 }
 0x57a   : > { %v1829_v32 = vadd.f32 %v4495_v29, %v1821_v30  ;;  %v4539_v29 = vld [vmem:[%s6495_s14 + $0xa0] sm:$0xff]  ;;  %v4538_v30 = vld [vmem:[%s6495_s14 + $0x98] sm:$0xff]  ;;  %v4537_v31 = vld [vmem:[%s6495_s14 + $0x90] sm:$0xff] }
 0x57c   : > { %v1830_v33 = vmax.f32 %v1829_v32, 0.0  ;;  %v4536_v32 = vld [vmem:[%s6495_s14 + $0x88] sm:$0xff] }
 0x57e   : > { %5077 = vmatpush3.msra.mxu0 %v1830_v33 }
 0x57f   : > { %5079 = vmatmul.mubr.msk.f32.vlgmr.msra.gmra.mxu0 %vm1037_vm3, %v1831_v34  ;;  %5081 = vmatprep.subr.mxu0 %v5496_v0 }
 0x580   : > { %5082 = vmatpush3.msra.mxu0 %v1830_v33  ;;  %5083 = vmatprep.mubr.msk.f32.mxu0 %vm5497_vm0, %v5496_v0 }
 0x581   : > { %5097 = vmatprep.subr.mxu0 %v5496_v0 }
 0x583   : > { %5084 = vmatmul.mubr.msk.f32.vlgmr.msra.gmra.mxu0 %vm1037_vm3, %v4497_v35 }
 0x584   : > { %5098 = vmatpush3.msra.mxu0 %v1908_v36  ;;  %5105 = vmatprep.mubr.msk.f32.mxu0 %vm5497_vm0, %v5496_v0 }
 0x585   : > { %5099 = vmatprep.subr.mxu0 %v5496_v0 }
 0x586   : > { %5100 = vmatpush3.msra.mxu0 %v1907_v37 }
 0x587   : > { %5101 = vmatprep.subr.mxu0 %v5496_v0 }
 0x588   : > { %5102 = vmatpush3.msra.mxu0 %v1906_v38  ;;  %v6080_v38 = vld [vmem:[%s6497_s16] sm:$0xff] }
 0x589   : > { %5103 = vmatprep.subr.mxu0 %v5496_v0 }
 0x58a   : > { %5104 = vmatpush3.msra.mxu0 %v1905_v39  ;;  %v2921_v39 = vld [vmem:[%s6498_s17 + $0x38] sm:$0xff] }
 0x58b   : > { %5113 = vmatprep.subr.mxu0 %v5496_v0 }
 0x63f   : > { %v1901_v42 = vpop.f32.mrf.mxu0 }
 0x640   : > { %5106 = vmatmul.mubr.msk.f32.vlgmr.msra.gmra.mxu0 %vm1521_vm6, %v1901_v42  ;;  %v2918_v42 = vld [vmem:[%s6498_s17 + $0x20] sm:$0xff] }
 0x641   : > { %v5080_v43 = vpop.f32.mrf.mxu0  ;;  %5121 = vmatprep.mubr.msk.f32.mxu0 %vm5497_vm0, %v5496_v0  ;;  %5114 = vmatpush3.msra.mxu0 %v4510_v47 }
 0x642   : > { %5115 = vmatprep.subr.mxu0 %v5496_v0  ;;  %v2917_v43 = vld [vmem:[%s6498_s17 + $0x18] sm:$0xff] }
 0x643   : > { %v1980_v44 = vpop.f32.mrf.mxu0  ;;  %5116 = vmatpush3.msra.mxu0 %v4509_v48 }
 0x644   : > { %5095 = vmatmul.mubr.msk.f32.vlgmr.msra.gmra.mxu1 %vm1521_vm6, %v1980_v44  ;;  %5117 = vmatprep.subr.mxu0 %v5496_v0  ;;  %v2916_v44 = vld [vmem:[%s6498_s17 + $0x10] sm:$0xff] }
 0x645   : > { %5109 = vmatpush3.msra.mxu1 %v1830_v33  ;;  %v5085_v45 = vpop.f32.mrf.mxu0  ;;  %5110 = vmatprep.mubr.msk.f32.mxu1 %vm5497_vm0, %v5496_v0  ;;  %v4535_v33 = vld [vmem:[%s6495_s14 + $0x80] sm:$0xff] }
 0x646   : > { %5118 = vmatpush3.msra.mxu0 %v4508_v49  ;;  %v4545_v49 = vld [vmem:[%s6496_s15] ss:$0 sm:$0xff] }
 0x647   : > { %5119 = vmatprep.subr.mxu0 %v5496_v0  ;;  %v4525_v0 = vld [vmem:[%s6495_s14 + $0x70] sm:$0xff] }
 0x648   : > { %5111 = vmatmul.mubr.msk.f32.vlgmr.msra.gmra.mxu1 %vm1037_vm3, %v4505_v46  ;;  %5120 = vmatpush3.msra.mxu0 %v4507_v50 }
 0x649   : > { %5134 = vmatprep.subr.mxu0 %v4526_v51  ;;  %5126 = vmatprep.mubr.msk.f32.mxu1 %vm1037_vm3, %v2298_v2  ;;  %v4554_v2 = vld [vmem:[%s6498_s17 + $0x50] sm:$0xff] }
 0x700   : > { %v2131_v52 = vpop.f32.mrf.mxu0 }
 0x702   : > { %v5107_v53 = vpop.f32.mrf.mxu0 }
 0x704   : > { %v2058_v54 = vpop.f32.mrf.mxu1 }
 0x705   : > { %v2132_v55 = vadd.f32 %v2131_v52, %v2058_v54 }
 0x706   : > { %v5096_v56 = vpop.f32.mrf.mxu1 }
 0x708   : > { %v2206_v57 = vpop.f32.mrf.mxu1 }
 0x709   : > { %5122 = vmatmul.mubr.msk.f32.vlgmr.msra.gmra.mxu0 %vm1521_vm6, %v2206_v57 }
 0x70a   : > { %v5112_v58 = vpop.f32.mrf.mxu1  ;;  %5135 = vmatpush3.msra.mxu0 %v4526_v51 }
 0x70b   : > { %5136 = vmatprep.subr.mxu0 %v4525_v0  ;;  %v6113_v58 = vld [vmem:[%s6497_s16 + $0x10] sm:$0xff] }
 0x70c   : > { %5137 = vmatpush3.msra.mxu0 %v4525_v0  ;;  %v6108_v0 = vld [vmem:[%s6497_s16 + $0x8] sm:$0xff] }
 0x70d   : > { %5138 = vmatprep.subr.mxu0 %v4524_v59 }
 0x70e   : > { %5139 = vmatpush3.msra.mxu0 %v4524_v59  ;;  %v6122_v59 = vld [vmem:[%s6497_s16 + $0x18] sm:$0xff] }
 0x70f   : > { %5140 = vmatprep.subr.mxu0 %v4523_v60 }
 0x710   : > { %5141 = vmatpush3.msra.mxu0 %v4523_v60  ;;  %v4559_v60 = vld [vmem:[%s6498_s17 + $0x78] sm:$0xff] }
 0x711   : > { %5142 = vmatprep.subr.mxu0 %v4522_v61 }
 0x712   : > { %5143 = vmatpush3.msra.mxu0 %v4522_v61  ;;  %v4558_v61 = vld [vmem:[%s6498_s17 + $0x70] sm:$0xff] }
 0x713   : > { %5144 = vmatprep.subr.mxu0 %v4521_v62 }
 0x714   : > { %5145 = vmatpush3.msra.mxu0 %v4521_v62  ;;  %v4557_v62 = vld [vmem:[%s6498_s17 + $0x68] sm:$0xff] }
 0x715   : > { %5146 = vmatprep.subr.mxu0 %v4520_v63 }
 0x716   : > { %5147 = vmatpush3.msra.mxu0 %v4520_v63  ;;  %v4556_v63 = vld [vmem:[%s6498_s17 + $0x60] sm:$0xff] }
 0x717   : > { %5148 = vmatprep.subr.mxu0 %v4519_v1 }
 0x718   : > { %5149 = vmatpush3.msra.mxu0 %v4519_v1  ;;  %v4555_v1 = vld [vmem:[%s6498_s17 + $0x58] sm:$0xff] }
 0x7c9   : > { %v2284_v3 = vpop.f32.mrf.mxu0 }
 0x7ca   : > { %v2288_v5 = vadd.f32 %v2284_v3, %v2132_v55  ;;  %v4553_v3 = vld [vmem:[%s6498_s17 + $0x48] sm:$0xff] }
 0x7cb   : > { %v5123_v6 = vpop.f32.mrf.mxu0 }
 0x7cc   : > { %v2296_v7 = vadd.f32 %v4512_v4, %v2288_v5  ;;  %v4552_v4 = vld [vmem:[%s6498_s17 + $0x40] sm:$0xff]  ;;  %v2915_v5 = vld [vmem:[%s6498_s17 + $0x8] sm:$0xff] }
 0x7cd   : > { %v2914_v6 = vld [vmem:[%s6498_s17] sm:$0xff] }
 0x7ce   : > { %v2297_v8 = vmax.f32 %v2296_v7, 0.0 }
 0x7d0   : > { %5124 = vmatprep.subr.mxu1 %v2297_v8  ;;  %5172 = vmatprep.subr.mxu0 %v2297_v8 }
 0x7d1   : > { %5125 = vmatpush3.msra.mxu1 %v2297_v8 }
 0x7d2   : > { %5127 = vmatmul.mubr.msk.f32.vlgmr.msra.gmra.mxu1 %vm1037_vm3, %v2299_v9  ;;  %5129 = vmatprep.subr.mxu1 %v2297_v8 }
 0x7d3   : > { %5130 = vmatpush3.msra.mxu1 %v2297_v8  ;;  %5131 = vmatprep.mubr.msk.f32.mxu1 %vm1037_vm3, %v4515_v10 }
 0x7d4   : > { %5153 = vmatprep.subr.mxu1 %v2388_v11 }
 0x7d6   : > { %5132 = vmatmul.mubr.msk.f32.vlgmr.msra.gmra.mxu1 %vm1037_vm3, %v4516_v12  ;;  %v6172_v12 = vld [vmem:[%s6497_s16 + $0x28] sm:$0xff] }
 0x7d7   : > { %5154 = vmatpush3.msra.mxu1 %v2388_v11  ;;  %v6163_v11 = vld [vmem:[%s6497_s16 + $0x20] sm:$0xff] }
 0x7d8   : > { %5155 = vmatprep.subr.mxu1 %v2387_v13 }
 0x7d9   : > { %5156 = vmatpush3.msra.mxu1 %v2387_v13  ;;  %v4575_v13 = vld [vmem:[%s6498_s17 + $0xb8] sm:$0xff] }
 0x7da   : > { %5157 = vmatprep.subr.mxu1 %v2386_v14 }
 0x7db   : > { %5158 = vmatpush3.msra.mxu1 %v2386_v14  ;;  %v4574_v14 = vld [vmem:[%s6498_s17 + $0xb0] sm:$0xff] }
 0x7dc   : > { %5159 = vmatprep.subr.mxu1 %v2385_v15 }
 0x7dd   : > { %5160 = vmatpush3.msra.mxu1 %v2385_v15  ;;  %v4573_v15 = vld [vmem:[%s6498_s17 + $0xa8] sm:$0xff] }
 0x7de   : > { %5161 = vmatprep.subr.mxu1 %v2384_v16 }
 0x7df   : > { %5162 = vmatpush3.msra.mxu1 %v2384_v16  ;;  %v4572_v16 = vld [vmem:[%s6498_s17 + $0xa0] sm:$0xff] }
 0x7e0   : > { %5163 = vmatprep.subr.mxu1 %v2383_v17 }
 0x7e1   : > { %5164 = vmatpush3.msra.mxu1 %v2383_v17  ;;  %v4571_v17 = vld [vmem:[%s6498_s17 + $0x98] sm:$0xff] }
 0x7e2   : > { %5165 = vmatprep.subr.mxu1 %v2382_v18 }
 0x7e3   : > { %5166 = vmatpush3.msra.mxu1 %v2382_v18  ;;  %v4570_v18 = vld [vmem:[%s6498_s17 + $0x90] sm:$0xff] }
 0x7e4   : > { %5167 = vmatprep.subr.mxu1 %v2381_v19 }
 0x7e5   : > { %5168 = vmatpush3.msra.mxu1 %v2381_v19  ;;  %v4569_v19 = vld [vmem:[%s6498_s17 + $0x88] sm:$0xff] }
 0x7e6   : > { %5177 = vmatprep.subr.mxu1 %v4542_v20 }
 0x892   : > { %v5128_v21 = vpop.f32.mrf.mxu1 }
 0x894   : > { %v2372_v22 = vpop.f32.mrf.mxu1 }
 0x895   : > { %5169 = vmatprep.mubr.msk.f32.mxu1 %vm880_vm2, %v2372_v22 }
 0x896   : > { %v5133_v24 = vpop.f32.mrf.mxu1  ;;  %5170 = vmatmul.mubr.msk.f32.vlgmr.msra.gmra.mxu1 %vm880_vm2, %v5128_v21 }
 0x897   : > { %5178 = vmatpush3.msra.mxu1 %v4542_v20  ;;  %v4568_v20 = vld [vmem:[%s6498_s17 + $0x80] sm:$0xff] }
 0x898   : > { %v2464_v25 = vpop.f32.mrf.mxu1  ;;  %5179 = vmatprep.subr.mxu1 %v4541_v23 }
 0x899   : > { %5150 = vmatprep.mubr.msk.f32.mxu0 %vm880_vm2, %v2464_v25  ;;  %5180 = vmatpush3.msra.mxu1 %v4541_v23  ;;  %v3454_v25 = vld [vmem:[%s6500_s19 + $0x78] sm:$0xff] }
 0x89a   : > { %5151 = vmatmul.mubr.msk.f32.vlgmr.msra.gmra.mxu0 %vm880_vm2, %v5133_v24  ;;  %5181 = vmatprep.subr.mxu1 %v4540_v28 }
 0x89b   : > { %5173 = vmatpush3.msra.mxu0 %v2297_v8  ;;  %5174 = vmatprep.mubr.msk.f32.mxu0 %vm1037_vm3, %v4531_v26  ;;  %v3453_v26 = vld [vmem:[%s6500_s19 + $0x70] sm:$0xff] }
 0x89c   : > { %5182 = vmatpush3.msra.mxu1 %v4540_v28  ;;  %v3451_v28 = vld [vmem:[%s6500_s19 + $0x60] sm:$0xff] }
 0x89d   : > { %5183 = vmatprep.subr.mxu1 %v4539_v29 }
 0x89e   : > { %5175 = vmatmul.mubr.msk.f32.vlgmr.msra.gmra.mxu0 %vm1037_vm3, %v4532_v27  ;;  %5184 = vmatpush3.msra.mxu1 %v4539_v29  ;;  %v3452_v27 = vld [vmem:[%s6500_s19 + $0x68] sm:$0xff]  ;;  %v3450_v29 = vld [vmem:[%s6500_s19 + $0x58] sm:$0xff] }
 0x89f   : > { %5185 = vmatprep.subr.mxu1 %v4538_v30  ;;  %5200 = vmatprep.mubr.msk.f32.mxu0 %vm714_vm1, %v6080_v38 }
 0x8a0   : > { %5186 = vmatpush3.msra.mxu1 %v4538_v30  ;;  %v3449_v30 = vld [vmem:[%s6500_s19 + $0x50] sm:$0xff] }
 0x8a1   : > { %5187 = vmatprep.subr.mxu1 %v4537_v31 }
 0x8a2   : > { %5188 = vmatpush3.msra.mxu1 %v4537_v31  ;;  %v3448_v31 = vld [vmem:[%s6500_s19 + $0x48] sm:$0xff] }
 0x8a3   : > { %5189 = vmatprep.subr.mxu1 %v4536_v32 }
 0x8a4   : > { %5190 = vmatpush3.msra.mxu1 %v4536_v32  ;;  %v3447_v32 = vld [vmem:[%s6500_s19 + $0x40] sm:$0xff] }
 0x8a5   : > { %5191 = vmatprep.subr.mxu1 %v4535_v33 }
 0x8a6   : > { %5192 = vmatpush3.msra.mxu1 %v4535_v33  ;;  %v3446_v33 = vld [vmem:[%s6500_s19 + $0x38] sm:$0xff] }
 0x8a7   : > { %5229 = vmatprep.subr.mxu1 %v2921_v39 }
 0x956   : > { %v5171_v45 = vpop.f32.mrf.mxu1 }
 0x958   : > { %v2635_v46 = vpop.f32.mrf.mxu1 }
 0x95a   : > { %v5152_v34 = vpop.f32.mrf.mxu0 }
 0x95b   : > { %v2641_v47 = vadd.f32 %v5171_v45, %v5152_v34  ;;  %v3445_v34 = vld [vmem:[%s6500_s19 + $0x30] sm:$0xff] }
 0x95c   : > { %v2554_v35 = vpop.f32.mrf.mxu0 }
 0x95d   : > { %v2636_v50 = vadd.f32 %v2635_v46, %v2554_v35  ;;  %v3444_v35 = vld [vmem:[%s6500_s19 + $0x28] sm:$0xff] }
 0x95e   : > { %v5176_v36 = vpop.f32.mrf.mxu0 }
 0x960   : > { %v2719_v37 = vpop.f32.mrf.mxu0 }
 0x961   : > { %5193 = vmatprep.mubr.msk.f32.mxu1 %vm880_vm2, %v2719_v37  ;;  %v3442_v37 = vld [vmem:[%s6500_s19 + $0x18] sm:$0xff] }
 0x962   : > { %5194 = vmatmul.mubr.msk.f32.vlgmr.msra.gmra.mxu1 %vm880_vm2, %v5176_v36  ;;  %v3443_v36 = vld [vmem:[%s6500_s19 + $0x20] sm:$0xff] }
 0x963   : > { %5230 = vmatpush3.msra.mxu1 %v2921_v39  ;;  %v3441_v39 = vld [vmem:[%s6500_s19 + $0x10] sm:$0xff] }
 0x964   : > { %5231 = vmatprep.subr.mxu1 %v2920_v40 }
 0x965   : > { %5232 = vmatpush3.msra.mxu1 %v2920_v40 }
 0x966   : > { %5233 = vmatprep.subr.mxu1 %v2919_v41 }
 0x967   : > { %5234 = vmatpush3.msra.mxu1 %v2919_v41 }
 0x968   : > { %5235 = vmatprep.subr.mxu1 %v2918_v42 }
 0x969   : > { %5236 = vmatpush3.msra.mxu1 %v2918_v42 }
 0x96a   : > { %5237 = vmatprep.subr.mxu1 %v2917_v43 }
 0x96b   : > { %5238 = vmatpush3.msra.mxu1 %v2917_v43 }
 0x96c   : > { %5239 = vmatprep.subr.mxu1 %v2916_v44 }
 0x96d   : > { %5240 = vmatpush3.msra.mxu1 %v2916_v44  ;;  %v4578_v44 = vld [vmem:[%s6499_s18] ss:$0 sm:$0xff] }
 0x96e   : > { %5241 = vmatprep.subr.mxu1 %v2915_v5 }
 0x96f   : > { %5242 = vmatpush3.msra.mxu1 %v2915_v5  ;;  %v4585_v5 = vld [vmem:[%s6500_s19 + $0x90] sm:$0xff] }
 0x970   : > { %5243 = vmatprep.subr.mxu1 %v2914_v6 }
 0x971   : > { %5244 = vmatpush3.msra.mxu1 %v2914_v6  ;;  %v4584_v6 = vld [vmem:[%s6500_s19 + $0x88] sm:$0xff] }
 0xa22   : > { %v5195_v48 = vpop.f32.mrf.mxu1 }
 0xa23   : > { %v2819_v51 = vadd.f32 %v5195_v48, %v2641_v47 }
 0xa24   : > { %v2809_v52 = vpop.f32.mrf.mxu1 }
 0xa25   : > { %v2828_v53 = vadd.f32 %v4545_v49, %v2819_v51  ;;  %v2818_v54 = vadd.f32 %v2809_v52, %v2636_v50 }
 0xa27   : > { %v2830_v55 = vmax.f32 %v2828_v53, 0.0  ;;  %v2827_v56 = vadd.f32 %v4545_v49, %v2818_v54  ;;  %v4598_v53 = vld [vmem:[%s6500_s19 + $0xf8] sm:$0xff]  ;;  %v4597_v54 = vld [vmem:[%s6500_s19 + $0xf0] sm:$0xff] }
 0xa29   : > { %v2829_v57 = vmax.f32 %v2827_v56, 0.0  ;;  %5196 = vmatprep.subr.mxu0 %v2830_v55  ;;  %v4595_v56 = vld [vmem:[%s6500_s19 + $0xe0] sm:$0xff] }
 0xa2a   : > { %5197 = vmatpush3.msra.mxu0 %v2830_v55 }
 0xa2b   : > { %5198 = vmatprep.subr.mxu0 %v2829_v57 }
 0xa2c   : > { %5199 = vmatpush3.msra.mxu0 %v2829_v57 }
 0xa2d   : > { %5201 = vmatmul.mubr.msk.f32.vlgmr.msra.gmra.mxu0 %vm714_vm1, %v6108_v0  ;;  %5203 = vmatprep.subr.mxu0 %v2830_v55 }
 0xa2e   : > { %5204 = vmatpush3.msra.mxu0 %v2830_v55  ;;  %5207 = vmatprep.mubr.msk.f32.mxu0 %vm714_vm1, %v6113_v58 }
 0xa2f   : > { %5205 = vmatprep.subr.mxu0 %v2829_v57 }
 0xa30   : > { %5206 = vmatpush3.msra.mxu0 %v2829_v57 }
 0xa31   : > { %5208 = vmatmul.mubr.msk.f32.vlgmr.msra.gmra.mxu0 %vm714_vm1, %v6122_v59  ;;  %5210 = vmatprep.subr.mxu0 %v4559_v60 }
 0xa32   : > { %5211 = vmatpush3.msra.mxu0 %v4559_v60  ;;  %v4593_v60 = vld [vmem:[%s6500_s19 + $0xd0] sm:$0xff] }
 0xa33   : > { %5212 = vmatprep.subr.mxu0 %v4558_v61 }
 0xa34   : > { %5213 = vmatpush3.msra.mxu0 %v4558_v61  ;;  %v4592_v61 = vld [vmem:[%s6500_s19 + $0xc8] sm:$0xff] }
 0xa35   : > { %5214 = vmatprep.subr.mxu0 %v4557_v62 }
 0xa36   : > { %5215 = vmatpush3.msra.mxu0 %v4557_v62  ;;  %v4591_v62 = vld [vmem:[%s6500_s19 + $0xc0] sm:$0xff] }
 0xa37   : > { %5216 = vmatprep.subr.mxu0 %v4556_v63 }
 0xa38   : > { %5217 = vmatpush3.msra.mxu0 %v4556_v63  ;;  %v4590_v63 = vld [vmem:[%s6500_s19 + $0xb8] sm:$0xff] }
 0xa39   : > { %5218 = vmatprep.subr.mxu0 %v4555_v1 }
 0xa3a   : > { %5219 = vmatpush3.msra.mxu0 %v4555_v1  ;;  %v4589_v1 = vld [vmem:[%s6500_s19 + $0xb0] sm:$0xff] }
 0xa3b   : > { %5220 = vmatprep.subr.mxu0 %v4554_v2 }
 0xa3c   : > { %5221 = vmatpush3.msra.mxu0 %v4554_v2  ;;  %v4588_v2 = vld [vmem:[%s6500_s19 + $0xa8] sm:$0xff] }
 0xa3d   : > { %5222 = vmatprep.subr.mxu0 %v4553_v3 }
 0xa3e   : > { %5223 = vmatpush3.msra.mxu0 %v4553_v3  ;;  %v4587_v3 = vld [vmem:[%s6500_s19 + $0xa0] sm:$0xff] }
 0xa3f   : > { %5224 = vmatprep.subr.mxu0 %v4552_v4 }
 0xa40   : > { %5225 = vmatpush3.msra.mxu0 %v4552_v4  ;;  %v4586_v4 = vld [vmem:[%s6500_s19 + $0x98] sm:$0xff] }
 0xa41   : > { %5248 = vmatprep.subr.mxu0 %v2830_v55 }
 0xaed   : > { %v5202_v7 = vpop.f32.mrf.mxu0 }
 0xaef   : > { %v2905_v8 = vpop.f32.mrf.mxu0 }
 0xaf0   : > { %5245 = vmatprep.mubr.msk.f32.mxu1 %vm880_vm2, %v2905_v8  ;;  %v3440_v8 = vld [vmem:[%s6500_s19 + $0x8] sm:$0xff] }
 0xaf1   : > { %v5209_v9 = vpop.f32.mrf.mxu0  ;;  %5246 = vmatmul.mubr.msk.f32.vlgmr.msra.gmra.mxu1 %vm880_vm2, %v5202_v7  ;;  %v4583_v7 = vld [vmem:[%s6500_s19 + $0x80] sm:$0xff] }
 0xaf2   : > { %5278 = vmatprep.mubr.msk.f32.mxu1 %vm714_vm1, %v6080_v38 }
 0xaf3   : > { %v2997_v10 = vpop.f32.mrf.mxu0 }
 0xaf4   : > { %5226 = vmatprep.mubr.msk.f32.mxu0 %vm880_vm2, %v2997_v10 }
 0xaf5   : > { %5227 = vmatmul.mubr.msk.f32.vlgmr.msra.gmra.mxu0 %vm880_vm2, %v5209_v9  ;;  %v3439_v9 = vld [vmem:[%s6500_s19] sm:$0xff] }
 0xaf6   : > { %5249 = vmatpush3.msra.mxu0 %v2830_v55  ;;  %5252 = vmatprep.mubr.msk.f32.mxu0 %vm714_vm1, %v6163_v11  ;;  %v4596_v55 = vld [vmem:[%s6500_s19 + $0xe8] sm:$0xff] }
 0xaf7   : > { %5250 = vmatprep.subr.mxu0 %v2829_v57 }
 0xaf8   : > { %5251 = vmatpush3.msra.mxu0 %v2829_v57  ;;  %v4594_v57 = vld [vmem:[%s6500_s19 + $0xd8] sm:$0xff] }
 0xaf9   : > { %5253 = vmatmul.mubr.msk.f32.vlgmr.msra.gmra.mxu0 %vm714_vm1, %v6172_v12  ;;  %5255 = vmatprep.subr.mxu0 %v4575_v13 }
 0xafa   : > { %5256 = vmatpush3.msra.mxu0 %v4575_v13 }
 0xafb   : > { %5257 = vmatprep.subr.mxu0 %v4574_v14 }
 0xafc   : > { %5258 = vmatpush3.msra.mxu0 %v4574_v14 }
 0xafd   : > { %5259 = vmatprep.subr.mxu0 %v4573_v15 }
 0xafe   : > { %5260 = vmatpush3.msra.mxu0 %v4573_v15 }
 0xaff   : > { %5261 = vmatprep.subr.mxu0 %v4572_v16 }
 0xb00   : > { %5262 = vmatpush3.msra.mxu0 %v4572_v16  ;;  %v4616_v16 = vld [vmem:[%s6500_s19 + $0x178] sm:$0xff] }
 0xb01   : > { %5263 = vmatprep.subr.mxu0 %v4571_v17 }
 0xb02   : > { %5264 = vmatpush3.msra.mxu0 %v4571_v17  ;;  %v4614_v17 = vld [vmem:[%s6500_s19 + $0x168] sm:$0xff] }
 0xb03   : > { %5265 = vmatprep.subr.mxu0 %v4570_v18 }
 0xb04   : > { %5266 = vmatpush3.msra.mxu0 %v4570_v18  ;;  %v4613_v18 = vld [vmem:[%s6500_s19 + $0x160] sm:$0xff] }
 0xb05   : > { %5267 = vmatprep.subr.mxu0 %v4569_v19 }
 0xb06   : > { %5268 = vmatpush3.msra.mxu0 %v4569_v19  ;;  %v4612_v19 = vld [vmem:[%s6500_s19 + $0x158] sm:$0xff] }
 0xb07   : > { %5269 = vmatprep.subr.mxu0 %v4568_v20 }
 0xb08   : > { %5270 = vmatpush3.msra.mxu0 %v4568_v20  ;;  %v4611_v20 = vld [vmem:[%s6500_s19 + $0x150] sm:$0xff] }
 0xb09   : > { %5323 = vmatprep.subr.mxu0 %v3454_v25 }
 0xbb1   : > { %v5247_v40 = vpop.f32.mrf.mxu1 }
 0xbb3   : > { %v3168_v42 = vpop.f32.mrf.mxu1 }
 0xbb5   : > { %v5228_v21 = vpop.f32.mrf.mxu0 }
 0xbb6   : > { %v3174_v41 = vadd.f32 %v5247_v40, %v5228_v21  ;;  %v4610_v21 = vld [vmem:[%s6500_s19 + $0x148] sm:$0xff]  ;;  %v4617_v40 = vld [vmem:[%s6501_s20] ss:$0 sm:$0xff] }
 0xbb7   : > { %v3087_v22 = vpop.f32.mrf.mxu0 }
 0xbb8   : > { %v3169_v45 = vadd.f32 %v3168_v42, %v3087_v22  ;;  %v4609_v22 = vld [vmem:[%s6500_s19 + $0x140] sm:$0xff] }
 0xbb9   : > { %v5254_v23 = vpop.f32.mrf.mxu0 }
 0xbbb   : > { %v3252_v24 = vpop.f32.mrf.mxu0 }
 0xbbc   : > { %5271 = vmatprep.mubr.msk.f32.mxu0 %vm880_vm2, %v3252_v24  ;;  %v4607_v24 = vld [vmem:[%s6500_s19 + $0x130] sm:$0xff] }
 0xbbd   : > { %5272 = vmatmul.mubr.msk.f32.vlgmr.msra.gmra.mxu0 %vm880_vm2, %v5254_v23  ;;  %v4608_v23 = vld [vmem:[%s6500_s19 + $0x138] sm:$0xff] }
 0xbbe   : > { %5324 = vmatpush3.msra.mxu0 %v3454_v25  ;;  %v4606_v25 = vld [vmem:[%s6500_s19 + $0x128] sm:$0xff] }
 0xbbf   : > { %5325 = vmatprep.subr.mxu0 %v3453_v26 }
 0xbc0   : > { %5326 = vmatpush3.msra.mxu0 %v3453_v26  ;;  %v4605_v26 = vld [vmem:[%s6500_s19 + $0x120] sm:$0xff] }
 0xbc1   : > { %5327 = vmatprep.subr.mxu0 %v3452_v27 }
 0xbc2   : > { %5328 = vmatpush3.msra.mxu0 %v3452_v27  ;;  %v4604_v27 = vld [vmem:[%s6500_s19 + $0x118] sm:$0xff] }
 0xbc3   : > { %5329 = vmatprep.subr.mxu0 %v3451_v28 }
 0xbc4   : > { %5330 = vmatpush3.msra.mxu0 %v3451_v28  ;;  %v4603_v28 = vld [vmem:[%s6500_s19 + $0x110] sm:$0xff] }
 0xbc5   : > { %5331 = vmatprep.subr.mxu0 %v3450_v29 }
 0xbc6   : > { %5332 = vmatpush3.msra.mxu0 %v3450_v29  ;;  %v4602_v29 = vld [vmem:[%s6500_s19 + $0x108] sm:$0xff] }
 0xbc7   : > { %5333 = vmatprep.subr.mxu0 %v3449_v30 }
 0xbc8   : > { %5334 = vmatpush3.msra.mxu0 %v3449_v30  ;;  %v4601_v30 = vld [vmem:[%s6500_s19 + $0x100] sm:$0xff] }
 0xbc9   : > { %5335 = vmatprep.subr.mxu0 %v3448_v31 }
 0xbca   : > { %5336 = vmatpush3.msra.mxu0 %v3448_v31 }
 0xbcb   : > { %5337 = vmatprep.subr.mxu0 %v3447_v32 }
 0xbcc   : > { %5338 = vmatpush3.msra.mxu0 %v3447_v32 }
 0xbcd   : > { %5339 = vmatprep.subr.mxu0 %v3446_v33 }
 0xbce   : > { %5340 = vmatpush3.msra.mxu0 %v3446_v33 }
 0xbcf   : > { %5341 = vmatprep.subr.mxu0 %v3445_v34 }
 0xbd0   : > { %5342 = vmatpush3.msra.mxu0 %v3445_v34 }
 0xbd1   : > { %5343 = vmatprep.subr.mxu0 %v3444_v35 }
 0xbd2   : > { %5344 = vmatpush3.msra.mxu0 %v3444_v35 }
 0xbd3   : > { %5345 = vmatprep.subr.mxu0 %v3443_v36 }
 0xbd4   : > { %5346 = vmatpush3.msra.mxu0 %v3443_v36 }
 0xbd5   : > { %5347 = vmatprep.subr.mxu0 %v3442_v37 }
 0xbd6   : > { %5348 = vmatpush3.msra.mxu0 %v3442_v37 }
 0xbd7   : > { %5349 = vmatprep.subr.mxu0 %v3441_v39 }
 0xbd8   : > { %5350 = vmatpush3.msra.mxu0 %v3441_v39 }
 0xbd9   : > { %5351 = vmatprep.subr.mxu0 %v3440_v8 }
 0xbda   : > { %5352 = vmatpush3.msra.mxu0 %v3440_v8  ;;  %v3956_v8 = vld [vmem:[%s6502_s21 + $0x20] sm:$0xff] }
 0xbdb   : > { %5353 = vmatprep.subr.mxu0 %v3439_v9 }
 0xbdc   : > { %5354 = vmatpush3.msra.mxu0 %v3439_v9  ;;  %v3955_v9 = vld [vmem:[%s6502_s21 + $0x18] sm:$0xff] }
 0xc7d   : > { %v5273_v43 = vpop.f32.mrf.mxu0 }
 0xc7e   : > { %v3352_v46 = vadd.f32 %v5273_v43, %v3174_v41 }
 0xc7f   : > { %v3342_v47 = vpop.f32.mrf.mxu0 }
 0xc80   : > { %v3361_v48 = vadd.f32 %v4578_v44, %v3352_v46  ;;  %v3351_v49 = vadd.f32 %v3342_v47, %v3169_v45 }
 0xc82   : > { %v6247_v50 = vmax.f32 %v3361_v48, 0.0  ;;  %v3360_v51 = vadd.f32 %v4578_v44, %v3351_v49  ;;  %v4628_v49 = vld [vmem:[%s6502_s21 + $0x70] sm:$0xff] }
 0xc84   : > { %v6249_v52 = vmax.f32 %v3360_v51, 0.0  ;;  %5274 = vmatprep.subr.mxu1 %v6247_v50  ;;  %v4622_v51 = vld [vmem:[%s6502_s21 + $0x40] sm:$0xff] }
 0xc85   : > { %5275 = vmatpush3.msra.mxu1 %v6247_v50 }
 0xc86   : > { %5276 = vmatprep.subr.mxu1 %v6249_v52 }
 0xc87   : > { %5277 = vmatpush3.msra.mxu1 %v6249_v52 }
 0xc88   : > { %5279 = vmatmul.mubr.msk.f32.vlgmr.msra.gmra.mxu1 %vm714_vm1, %v6108_v0  ;;  %5281 = vmatprep.subr.mxu1 %v6247_v50 }
 0xc89   : > { %5282 = vmatpush3.msra.mxu1 %v6247_v50  ;;  %5285 = vmatprep.mubr.msk.f32.mxu1 %vm714_vm1, %v6113_v58 }
 0xc8a   : > { %5283 = vmatprep.subr.mxu1 %v6249_v52 }
 0xc8b   : > { %5284 = vmatpush3.msra.mxu1 %v6249_v52 }
 0xc8c   : > { %5286 = vmatmul.mubr.msk.f32.vlgmr.msra.gmra.mxu1 %vm714_vm1, %v6122_v59  ;;  %5288 = vmatprep.subr.mxu1 %v4598_v53 }
 0xc8d   : > { %5289 = vmatpush3.msra.mxu1 %v4598_v53  ;;  %v4642_v53 = vld [vmem:[%s6502_s21 + $0xb0] sm:$0xff] }
 0xc8e   : > { %5290 = vmatprep.subr.mxu1 %v4597_v54 }
 0xc8f   : > { %5291 = vmatpush3.msra.mxu1 %v4597_v54  ;;  %v3959_v54 = vld [vmem:[%s6502_s21 + $0x38] sm:$0xff] }
 0xc90   : > { %5292 = vmatprep.subr.mxu1 %v4596_v55 }
 0xc91   : > { %5293 = vmatpush3.msra.mxu1 %v4596_v55  ;;  %v4641_v55 = vld [vmem:[%s6502_s21 + $0xa8] sm:$0xff] }
 0xc92   : > { %5294 = vmatprep.subr.mxu1 %v4595_v56 }
 0xc93   : > { %5295 = vmatpush3.msra.mxu1 %v4595_v56  ;;  %v4640_v56 = vld [vmem:[%s6502_s21 + $0xa0] sm:$0xff] }
 0xc94   : > { %5296 = vmatprep.subr.mxu1 %v4594_v57 }
 0xc95   : > { %5297 = vmatpush3.msra.mxu1 %v4594_v57  ;;  %v4639_v57 = vld [vmem:[%s6502_s21 + $0x98] sm:$0xff] }
 0xc96   : > { %5298 = vmatprep.subr.mxu1 %v4593_v60 }
 0xc97   : > { %5299 = vmatpush3.msra.mxu1 %v4593_v60  ;;  %v4638_v60 = vld [vmem:[%s6502_s21 + $0x90] sm:$0xff] }
 0xc98   : > { %5300 = vmatprep.subr.mxu1 %v4592_v61 }
 0xc99   : > { %5301 = vmatpush3.msra.mxu1 %v4592_v61  ;;  %v4637_v61 = vld [vmem:[%s6502_s21 + $0x88] sm:$0xff] }
 0xc9a   : > { %5302 = vmatprep.subr.mxu1 %v4591_v62 }
 0xc9b   : > { %5303 = vmatpush3.msra.mxu1 %v4591_v62  ;;  %v4636_v62 = vld [vmem:[%s6502_s21 + $0x80] sm:$0xff] }
 0xc9c   : > { %5304 = vmatprep.subr.mxu1 %v4590_v63 }
 0xc9d   : > { %5305 = vmatpush3.msra.mxu1 %v4590_v63 }
 0xc9e   : > { %5306 = vmatprep.subr.mxu1 %v4589_v1 }
 0xc9f   : > { %5307 = vmatpush3.msra.mxu1 %v4589_v1 }
 0xca0   : > { %5308 = vmatprep.subr.mxu1 %v4588_v2 }
 0xca1   : > { %5309 = vmatpush3.msra.mxu1 %v4588_v2 }
 0xca2   : > { %5310 = vmatprep.subr.mxu1 %v4587_v3 }
 0xca3   : > { %5311 = vmatpush3.msra.mxu1 %v4587_v3 }
 0xca4   : > { %5312 = vmatprep.subr.mxu1 %v4586_v4 }
 0xca5   : > { %5313 = vmatpush3.msra.mxu1 %v4586_v4 }
 0xca6   : > { %5314 = vmatprep.subr.mxu1 %v4585_v5 }
 0xca7   : > { %5315 = vmatpush3.msra.mxu1 %v4585_v5 }
 0xca8   : > { %5316 = vmatprep.subr.mxu1 %v4584_v6 }
 0xca9   : > { %5317 = vmatpush3.msra.mxu1 %v4584_v6  ;;  %v3958_v6 = vld [vmem:[%s6502_s21 + $0x30] sm:$0xff] }
 0xcaa   : > { %5318 = vmatprep.subr.mxu1 %v4583_v7 }
 0xcab   : > { %5319 = vmatpush3.msra.mxu1 %v4583_v7  ;;  %v3957_v7 = vld [vmem:[%s6502_s21 + $0x28] sm:$0xff] }
 0xcac   : > { %5358 = vmatprep.subr.mxu1 %v6247_v50 }
 0xd48   : > { %v5280_v10 = vpop.f32.mrf.mxu1 }
 0xd4a   : > { %v3430_v13 = vpop.f32.mrf.mxu1 }
 0xd4b   : > { %5355 = vmatprep.mubr.f32.mxu0 %v3430_v13  ;;  %v3953_v13 = vld [vmem:[%s6502_s21 + $0x8] sm:$0xff] }
 0xd4c   : > { %v5287_v14 = vpop.f32.mrf.mxu1  ;;  %5356 = vmatmul.mubr.f32.vlgmr.msra.gmra.mxu0 %v5280_v10  ;;  %v3954_v10 = vld [vmem:[%s6502_s21 + $0x10] sm:$0xff] }
 0xd4d   : > { %5404 = vmatprep.mubr.msk.f32.mxu0 %vm714_vm1, %v6080_v38  ;;  %v4615_v38 = vld [vmem:[%s6500_s19 + $0x170] sm:$0xff] }
 0xd4e   : > { %v3521_v15 = vpop.f32.mrf.mxu1 }
 0xd4f   : > { %5320 = vmatprep.mubr.f32.mxu1 %v3521_v15 }
 0xd50   : > { %5321 = vmatmul.mubr.f32.vlgmr.msra.gmra.mxu1 %v5287_v14  ;;  %v3952_v14 = vld [vmem:[%s6502_s21] sm:$0xff] }
 0xd51   : > { %5359 = vmatpush3.msra.mxu1 %v6247_v50  ;;  %5362 = vmatprep.mubr.msk.f32.mxu1 %vm714_vm1, %v6163_v11  ;;  %v4623_v50 = vld [vmem:[%s6502_s21 + $0x48] sm:$0xff] }
 0xd52   : > { %5360 = vmatprep.subr.mxu1 %v6249_v52 }
 0xd53   : > { %5361 = vmatpush3.msra.mxu1 %v6249_v52  ;;  %v4643_v52 = vld [vmem:[%s6502_s21 + $0xb8] sm:$0xff] }
 0xd54   : > { %5363 = vmatmul.mubr.msk.f32.vlgmr.msra.gmra.mxu1 %vm714_vm1, %v6172_v12  ;;  %5365 = vmatprep.subr.mxu1 %v4616_v16 }
 0xd55   : > { %5366 = vmatpush3.msra.mxu1 %v4616_v16 }
 0xd56   : > { %5367 = vmatprep.subr.mxu1 %v4615_v38 }
 0xd57   : > { %5368 = vmatpush3.msra.mxu1 %v4615_v38 }
 0xd58   : > { %5369 = vmatprep.subr.mxu1 %v4614_v17 }
 0xd59   : > { %5370 = vmatpush3.msra.mxu1 %v4614_v17 }
 0xd5a   : > { %5371 = vmatprep.subr.mxu1 %v4613_v18 }
 0xd5b   : > { %5372 = vmatpush3.msra.mxu1 %v4613_v18 }
 0xd5c   : > { %5373 = vmatprep.subr.mxu1 %v4612_v19 }
 0xd5d   : > { %5374 = vmatpush3.msra.mxu1 %v4612_v19  ;;  %v4646_v19 = vld [vmem:[%s6503_s22] ss:$0 sm:$0xff] }
 0xd5e   : > { %5375 = vmatprep.subr.mxu1 %v4611_v20 }
 0xd5f   : > { %5376 = vmatpush3.msra.mxu1 %v4611_v20 }
 0xd60   : > { %5377 = vmatprep.subr.mxu1 %v4610_v21 }
 0xd61   : > { %5378 = vmatpush3.msra.mxu1 %v4610_v21 }
 0xd62   : > { %5379 = vmatprep.subr.mxu1 %v4609_v22 }
 0xd63   : > { %5380 = vmatpush3.msra.mxu1 %v4609_v22 }
 0xd64   : > { %5381 = vmatprep.subr.mxu1 %v4608_v23 }
 0xd65   : > { %5382 = vmatpush3.msra.mxu1 %v4608_v23 }
 0xd66   : > { %5383 = vmatprep.subr.mxu1 %v4607_v24 }
 0xd67   : > { %5384 = vmatpush3.msra.mxu1 %v4607_v24 }
 0xd68   : > { %5385 = vmatprep.subr.mxu1 %v4606_v25 }
 0xd69   : > { %5386 = vmatpush3.msra.mxu1 %v4606_v25 }
 0xd6a   : > { %5387 = vmatprep.subr.mxu1 %v4605_v26 }
 0xd6b   : > { %5388 = vmatpush3.msra.mxu1 %v4605_v26 }
 0xd6c   : > { %5389 = vmatprep.subr.mxu1 %v4604_v27 }
 0xd6d   : > { %5390 = vmatpush3.msra.mxu1 %v4604_v27 }
 0xd6e   : > { %5391 = vmatprep.subr.mxu1 %v4603_v28 }
 0xd6f   : > { %5392 = vmatpush3.msra.mxu1 %v4603_v28 }
 0xd70   : > { %5393 = vmatprep.subr.mxu1 %v4602_v29 }
 0xd71   : > { %5394 = vmatpush3.msra.mxu1 %v4602_v29 }
 0xd72   : > { %5395 = vmatprep.subr.mxu1 %v4601_v30 }
 0xd73   : > { %5396 = vmatpush3.msra.mxu1 %v4601_v30 }
 0xe0c   : > { %v5357_v35 = vpop.f32.mrf.mxu0 }
 0xe0e   : > { %v3688_v37 = vpop.f32.mrf.mxu0 }
 0xe10   : > { %v5322_v31 = vpop.f32.mrf.mxu1 }
 0xe11   : > { %v3694_v36 = vadd.f32 %v5357_v35, %v5322_v31 }
 0xe12   : > { %v3613_v32 = vpop.f32.mrf.mxu1 }
 0xe13   : > { %v3689_v41 = vadd.f32 %v3688_v37, %v3613_v32 }
 0xe14   : > { %v5364_v33 = vpop.f32.mrf.mxu1 }
 0xe16   : > { %v3763_v34 = vpop.f32.mrf.mxu1 }
 0xe17   : > { %5397 = vmatprep.mubr.f32.mxu1 %v3763_v34 }
 0xe18   : > { %5398 = vmatmul.mubr.f32.vlgmr.msra.gmra.mxu1 %v5364_v33 }
 0xe19   : > { %5456 = vmatprep.mubr.msk.f32.mxu1 %vm714_vm1, %v6163_v11  ;;  %v4629_v11 = vld [vmem:[%s6502_s21 + $0x78] sm:$0xff] }
 0xed8   : > { %v5399_v39 = vpop.f32.mrf.mxu1 }
 0xed9   : > { %v3865_v42 = vadd.f32 %v5399_v39, %v3694_v36 }
 0xeda   : > { %v3855_v43 = vpop.f32.mrf.mxu1 }
 0xedb   : > { %v3874_v44 = vadd.f32 %v4617_v40, %v3865_v42  ;;  %v3864_v45 = vadd.f32 %v3855_v43, %v3689_v41 }
 0xedd   : > { %v3876_v46 = vmax.f32 %v3874_v44, 0.0  ;;  %v3873_v47 = vadd.f32 %v4617_v40, %v3864_v45 }
 0xedf   : > { %v3875_v48 = vmax.f32 %v3873_v47, 0.0  ;;  %5400 = vmatprep.subr.mxu0 %v3876_v46  ;;  %5452 = vmatprep.subr.mxu1 %v3876_v46 }
 0xee0   : > { %5401 = vmatpush3.msra.mxu0 %v3876_v46  ;;  %5453 = vmatpush3.msra.mxu1 %v3876_v46 }
 0xee1   : > { %5402 = vmatprep.subr.mxu0 %v3875_v48  ;;  %5454 = vmatprep.subr.mxu1 %v3875_v48 }
 0xee2   : > { %5403 = vmatpush3.msra.mxu0 %v3875_v48  ;;  %5455 = vmatpush3.msra.mxu1 %v3875_v48 }
 0xee3   : > { %5405 = vmatmul.mubr.msk.f32.vlgmr.msra.gmra.mxu0 %vm714_vm1, %v6108_v0  ;;  %5407 = vmatprep.subr.mxu0 %v3876_v46  ;;  %v4627_v0 = vld [vmem:[%s6502_s21 + $0x68] sm:$0xff] }
 0xee4   : > { %5408 = vmatpush3.msra.mxu0 %v3876_v46  ;;  %5411 = vmatprep.mubr.msk.f32.mxu0 %vm714_vm1, %v6113_v58  ;;  %v4626_v58 = vld [vmem:[%s6502_s21 + $0x60] sm:$0xff] }
 0xee5   : > { %5409 = vmatprep.subr.mxu0 %v3875_v48  ;;  %5457 = vmatmul.mubr.msk.f32.vlgmr.msra.gmra.mxu1 %vm714_vm1, %v6172_v12  ;;  %v4625_v12 = vld [vmem:[%s6502_s21 + $0x58] sm:$0xff] }
 0xee6   : > { %5410 = vmatpush3.msra.mxu0 %v3875_v48  ;;  %5459 = vmatprep.subr.mxu1 %v4643_v52 }
 0xee7   : > { %5412 = vmatmul.mubr.msk.f32.vlgmr.msra.gmra.mxu0 %vm714_vm1, %v6122_v59  ;;  %5414 = vmatprep.subr.mxu0 %v4629_v11  ;;  %v4624_v59 = vld [vmem:[%s6502_s21 + $0x50] sm:$0xff] }
 0xee8   : > { %5415 = vmatpush3.msra.mxu0 %v4629_v11  ;;  %5460 = vmatpush3.msra.mxu1 %v4643_v52 }
 0xee9   : > { %5416 = vmatprep.subr.mxu0 %v4628_v49  ;;  %5461 = vmatprep.subr.mxu1 %v4642_v53 }
 0xeea   : > { %5417 = vmatpush3.msra.mxu0 %v4628_v49  ;;  %5462 = vmatpush3.msra.mxu1 %v4642_v53 }
 0xeeb   : > { %5418 = vmatprep.subr.mxu0 %v4627_v0  ;;  %5463 = vmatprep.subr.mxu1 %v4641_v55 }
 0xeec   : > { %5419 = vmatpush3.msra.mxu0 %v4627_v0  ;;  %5464 = vmatpush3.msra.mxu1 %v4641_v55 }
 0xeed   : > { %5420 = vmatprep.subr.mxu0 %v4626_v58  ;;  %5465 = vmatprep.subr.mxu1 %v4640_v56 }
 0xeee   : > { %5421 = vmatpush3.msra.mxu0 %v4626_v58  ;;  %5466 = vmatpush3.msra.mxu1 %v4640_v56 }
 0xeef   : > { %5422 = vmatprep.subr.mxu0 %v4625_v12  ;;  %5467 = vmatprep.subr.mxu1 %v4639_v57 }
 0xef0   : > { %5423 = vmatpush3.msra.mxu0 %v4625_v12  ;;  %5468 = vmatpush3.msra.mxu1 %v4639_v57 }
 0xef1   : > { %5424 = vmatprep.subr.mxu0 %v4624_v59  ;;  %5469 = vmatprep.subr.mxu1 %v4638_v60 }
 0xef2   : > { %5425 = vmatpush3.msra.mxu0 %v4624_v59  ;;  %5470 = vmatpush3.msra.mxu1 %v4638_v60 }
 0xef3   : > { %5426 = vmatprep.subr.mxu0 %v4623_v50  ;;  %5471 = vmatprep.subr.mxu1 %v4637_v61 }
 0xef4   : > { %5427 = vmatpush3.msra.mxu0 %v4623_v50  ;;  %5472 = vmatpush3.msra.mxu1 %v4637_v61 }
 0xef5   : > { %5428 = vmatprep.subr.mxu0 %v4622_v51  ;;  %5473 = vmatprep.subr.mxu1 %v4636_v62 }
 0xef6   : > { %5429 = vmatpush3.msra.mxu0 %v4622_v51  ;;  %5474 = vmatpush3.msra.mxu1 %v4636_v62 }
 0xef7   : > { %5433 = vmatprep.subr.mxu0 %v3959_v54 }
 0xfa3   : > { %v5406_v63 = vpop.f32.mrf.mxu0 }
 0xfa5   : > { %v3943_v1 = vpop.f32.mrf.mxu0  ;;  %v5458_v2 = vpop.f32.mrf.mxu1 }
 0xfa7   : > { %v5413_v3 = vpop.f32.mrf.mxu0  ;;  %v4272_v4 = vpop.f32.mrf.mxu1 }
 0xfa8   : > { %5475 = vmatprep.mubr.msk.f32.mxu1 %vm880_vm2, %v4272_v4 }
 0xfa9   : > { %v4026_v5 = vpop.f32.mrf.mxu0  ;;  %5476 = vmatmul.mubr.msk.f32.vlgmr.msra.gmra.mxu1 %vm880_vm2, %v5458_v2 }
 0xfaa   : > { %5430 = vmatprep.mubr.msk.f32.mxu0 %vm880_vm2, %v4026_v5 }
 0xfab   : > { %5431 = vmatmul.mubr.msk.f32.vlgmr.msra.gmra.mxu0 %vm880_vm2, %v5413_v3 }
 0xfac   : > { %5434 = vmatpush3.msra.mxu0 %v3959_v54  ;;  %5449 = vmatprep.mubr.msk.f32.mxu0 %vm880_vm2, %v3943_v1 }
 0xfad   : > { %5435 = vmatprep.subr.mxu0 %v3958_v6 }
 0xfae   : > { %5436 = vmatpush3.msra.mxu0 %v3958_v6 }
 0xfaf   : > { %5437 = vmatprep.subr.mxu0 %v3957_v7 }
 0xfb0   : > { %5438 = vmatpush3.msra.mxu0 %v3957_v7 }
 0xfb1   : > { %5439 = vmatprep.subr.mxu0 %v3956_v8 }
 0xfb2   : > { %5440 = vmatpush3.msra.mxu0 %v3956_v8 }
 0xfb3   : > { %5441 = vmatprep.subr.mxu0 %v3955_v9 }
 0xfb4   : > { %5442 = vmatpush3.msra.mxu0 %v3955_v9 }
 0xfb5   : > { %5443 = vmatprep.subr.mxu0 %v3954_v10 }
 0xfb6   : > { %5444 = vmatpush3.msra.mxu0 %v3954_v10 }
 0xfb7   : > { %5445 = vmatprep.subr.mxu0 %v3953_v13 }
 0xfb8   : > { %5446 = vmatpush3.msra.mxu0 %v3953_v13 }
 0xfb9   : > { %5447 = vmatprep.subr.mxu0 %v3952_v14 }
 0xfba   : > { %5448 = vmatpush3.msra.mxu0 %v3952_v14 }
 0xfbb   : > { %5450 = vmatmul.mubr.msk.f32.vlgmr.msra.gmra.mxu0 %vm880_vm2, %v5406_v63 }
0x1069   : > { %v5477_v17 = vpop.f32.mrf.mxu1 }
0x106b   : > { %v5432_v15 = vpop.f32.mrf.mxu0  ;;  %v4362_v23 = vpop.f32.mrf.mxu1 }
0x106d   : > { %v4116_v16 = vpop.f32.mrf.mxu0 }
0x107b   : > { %v5451_v38 = vpop.f32.mrf.mxu0 }
0x107c   : > { %v4203_v18 = vadd.f32 %v5451_v38, %v5432_v15 }
0x107d   : > { %v4197_v20 = vpop.f32.mrf.mxu0 }
0x107e   : > { %v4372_v21 = vadd.f32 %v5477_v17, %v4203_v18  ;;  %v4198_v22 = vadd.f32 %v4197_v20, %v4116_v16 }
0x1080   : > { %v4381_v24 = vadd.f32 %v4646_v19, %v4372_v21  ;;  %v4371_v25 = vadd.f32 %v4362_v23, %v4198_v22 }
0x1082   : > { %4383 = vst.msk [vmem:[%s710_s24 + $0x8] sm:$0xff] %vm880_vm2, %v4381_v24  ;;  %v4380_v26 = vadd.f32 %v4646_v19, %v4371_v25 }
0x1084   : > { %4382 = vst.msk [vmem:[%s710_s24] sm:$0xff] %vm880_vm2, %v4380_v26 }
0x1085 PF: > { %s33_s4 = sadd.s32 1, %s5494_s4  }
0x1086   : > { %p30_p4 = scmp.ge.s32.totalorder %s33_s4, 4  }
0x1088   :  { %32 = sbr.rel (!%p30_p4) target bundleno = 9 (0x9), region = 166 }

</bundles_post_ra>
